<compile_context>
chip_gen: v6e
topology: v6e:2x2x1
jax: 0.10.0
libtpu: 0.0.40
codegen_flags: <defaults>
</compile_context>

<pallas_src>
import functools

import jax
import jax.numpy as jnp
from jax import lax
from jax.experimental import pallas as pl
from jax.experimental.pallas import tpu as pltpu


# -----------------------------------------------------------------------------
# Small helpers
# -----------------------------------------------------------------------------
def _round_up(x, m):
    return ((x + m - 1) // m) * m


def _pad_to(x, shape):
    pads = [(0, int(t) - int(s)) for s, t in zip(x.shape, shape)]
    if any(p[1] for p in pads):
        return jnp.pad(x, pads)
    return x


def _vmem_cap_bytes():
    try:
        return int(pltpu.get_tpu_info().vmem_capacity_bytes)
    except Exception:
        return 64 << 20            # conservative fallback: v7x per-core VMEM


def _vmem_budget_bytes():
    # ~half the physical VMEM for the pipelined working set; this automatically
    # halves tile sizes on v7x (64 MiB) relative to v5e/v6e (128 MiB).
    return int(min(_vmem_cap_bytes(), 128 << 20) * 0.5)


def _heads_vmem_bytes(tm, e, tf):
    # double-buffered x, w, bias and output blocks (f32, conservative)
    return 4 * (2 * tm * e + 2 * e * tf + 2 * tf + 2 * tm * tf)


def _biaffine_vmem_bytes(ts, tl, s, d):
    inp = 2 * (2 * ts * d + 2 * d * s)          # arc_d/lab_d + arc_hT/lab_hT
    wgt = 2 * (d * d + tl * d * d)              # wa_main + wl_main tile
    bia = 2 * (2 * d + 1 + 2 * tl * d + tl)     # rank-1/const bias pieces
    out = 2 * (ts * s + tl * ts * s)            # arc + lab blocks
    tmp = ts * tl * d + 2 * ts * s              # tmp_l + working values
    return 4 * (inp + wgt + bia + out + tmp)


# -----------------------------------------------------------------------------
# Kernel 1: fused linear heads   y = x @ [Warc_h|Warc_d|Wlab_h|Wlab_d|Wpos] + b
# -----------------------------------------------------------------------------
def _fused_heads_kernel(x_ref, w_ref, b_ref, o_ref):
    # x_ref: (TM, E), w_ref: (E, TF), b_ref: (1, TF), o_ref: (TM, TF)
    o_ref[...] = (
        jnp.dot(x_ref[...], w_ref[...], preferred_element_type=jnp.float32)
        + b_ref[...]
    ).astype(o_ref.dtype)


def _pick_row_tile(m):
    # cap at 256 (v5e default-VMEM friendly); m is always a multiple of 8.
    for t in (256, 128, 64, 32, 16, 8):
        if m % t == 0:
            return t
    return m


def _pick_col_tile(f, e, tm, budget):
    cands = [f] + [t for t in (2048, 1024, 512, 256, 128) if t < f and f % t == 0]
    for tf in cands:
        if _heads_vmem_bytes(tm, e, tf) <= budget:
            return tf
    return cands[-1]


def fused_linear_heads(x2d, w_all, b_all, *, compute_dtype=jnp.float32):
    m, e = x2d.shape
    f = w_all.shape[1]
    tm = _pick_row_tile(m)
    tf = _pick_col_tile(f, e, tm, _vmem_budget_bytes())
    footprint = _heads_vmem_bytes(tm, e, tf)
    vmem_limit = int(min(_vmem_cap_bytes(), max(footprint + (8 << 20), 32 << 20)))

    x2d = x2d.astype(compute_dtype)
    w_all = w_all.astype(compute_dtype)

    return pl.pallas_call(
        _fused_heads_kernel,
        out_shape=jax.ShapeDtypeStruct((m, f), jnp.float32),
        grid=(f // tf, m // tm),            # F outer: weight slab reused over rows
        in_specs=[
            pl.BlockSpec((tm, e), lambda j, i: (i, 0)),
            pl.BlockSpec((e, tf), lambda j, i: (0, j)),
            pl.BlockSpec((1, tf), lambda j, i: (0, j)),
        ],
        out_specs=pl.BlockSpec((tm, tf), lambda j, i: (i, j)),
        compiler_params=pltpu.CompilerParams(
            dimension_semantics=("parallel", "parallel"),
            vmem_limit_bytes=vmem_limit),
    )(x2d, w_all, b_all.reshape(1, f).astype(jnp.float32))


# -----------------------------------------------------------------------------
# Kernel 2: fused biaffine (arc + labels), grid = (B, S-row tiles, label tiles)
#
#   arc[b,x,y]   = ad·Wa·ah^T + ad·wa_d + wa_h·ah^T + wa_c
#   lab[b,o,x,y] = ld·Wl[o]·lh^T + ld·wl_d[o] + wl_h[o]·lh^T + wl_c[o]
#
# which is exactly einsum('bxi,oij,byj->bxyo') on the ones-augmented inputs.
# The h-side activations are passed pre-transposed as (B, D, S).
# -----------------------------------------------------------------------------
def _biaffine_kernel(*refs, tl, d, biased):
    f32 = jnp.float32
    if biased:
        (ad_ref, aht_ref, ld_ref, lht_ref,
         wam_ref, wad_ref, wah_ref, wac_ref,
         wlm_ref, wld_ref, wlh_ref, wlc_ref,
         arc_ref, lab_ref) = refs
    else:
        (ad_ref, aht_ref, ld_ref, lht_ref,
         wam_ref, wlm_ref, arc_ref, lab_ref) = refs

    lht = lht_ref[0]                          # (D, S)
    ld = ld_ref[0]                            # (TS, D)
    cdt = lht.dtype                           # MXU feed dtype (f32 or bf16)

    # ---- arc scores: only once per (batch, row-tile), on the first label tile
    @pl.when(pl.program_id(2) == 0)
    def _():
        ad = ad_ref[0]                        # (TS, D)
        aht = aht_ref[0]                      # (D, S)
        tmp_a = jnp.dot(ad, wam_ref[...], preferred_element_type=f32)      # (TS, D)
        s_a = jnp.dot(tmp_a.astype(cdt), aht, preferred_element_type=f32)  # (TS, S)
        if biased:
            db_a = jnp.dot(ad, wad_ref[...], preferred_element_type=f32)   # (TS, 1)
            hb_a = (jnp.dot(wah_ref[...], aht, preferred_element_type=f32)
                    + wac_ref[...])                                        # (1, S)
            s_a = s_a + db_a + hb_a
        arc_ref[0] = s_a.astype(arc_ref.dtype)

    # ---- label scores for this label tile: one wide d@W matmul, then
    #      per-label (TS,D)@(D,S) contractions (128-aligned static slices).
    tmp_l = jnp.dot(ld, wlm_ref[...], preferred_element_type=f32)          # (TS, TL*D)
    if biased:
        db_l = lax.dot_general(ld, wld_ref[...], (((1,), (1,)), ((), ())),
                               preferred_element_type=f32)                 # (TS, TL)
        hb_l = (jnp.dot(wlh_ref[...], lht, preferred_element_type=f32)
                + wlc_ref[...])                                            # (TL, S)
    for o in range(tl):                       # static unroll; TL <= 16 by design
        tmp_o = tmp_l[:, o * d:(o + 1) * d].astype(cdt)                    # (TS, D)
        s_o = jnp.dot(tmp_o, lht, preferred_element_type=f32)              # (TS, S)
        if biased:
            s_o = s_o + db_l[:, o:o + 1] + hb_l[o:o + 1, :]
        lab_ref[0, o] = s_o.astype(lab_ref.dtype)


def _pick_biaffine_tiles(s, d_pad, num_labels, budget):
    ts_list = [t for t in (256, 128, 64, 32, 16, 8) if t <= s and s % t == 0]
    if not ts_list:
        ts_list = [s]
    tl_list = [num_labels] if num_labels <= 16 else [16, 8]
    for tl in tl_list:
        for ts in ts_list:
            if _biaffine_vmem_bytes(ts, tl, s, d_pad) <= budget:
                return ts, tl
    return ts_list[-1], tl_list[-1]


def fused_biaffine(arc_d, arc_hT, lab_d, lab_hT, w_arc, w_lab, *,
                   biased, compute_dtype=jnp.float32):
    b, s, d_pad = arc_d.shape                # s, d_pad already padded/aligned
    num_labels = w_lab.shape[0]
    d = w_arc.shape[-1] - (1 if biased else 0)

    budget = _vmem_budget_bytes()
    ts, tl = _pick_biaffine_tiles(s, d_pad, num_labels, budget)
    l_pad = _round_up(num_labels, tl)
    n_st, n_lt = s // ts, l_pad // tl

    # Split the (D+1)-sized biaffine weights into aligned pieces: bilinear core
    # plus exact rank-1 / constant corrections (no ones-concat of activations).
    if biased:
        wa_main = _pad_to(w_arc[0, :d, :d], (d_pad, d_pad))
        wa_d = _pad_to(w_arc[0, :d, d], (d_pad,)).reshape(d_pad, 1)
        wa_h = _pad_to(w_arc[0, d, :d], (d_pad,)).reshape(1, d_pad)
        wa_c = w_arc[0, d, d].reshape(1, 1)
        wl_core = _pad_to(w_lab[:, :d, :d], (l_pad, d_pad, d_pad))
        wl_main = jnp.transpose(wl_core, (1, 0, 2)).reshape(d_pad, l_pad * d_pad)
        wl_d = _pad_to(w_lab[:, :d, d], (l_pad, d_pad))
        wl_h = _pad_to(w_lab[:, d, :d], (l_pad, d_pad))
        wl_c = _pad_to(w_lab[:, d, d], (l_pad,)).reshape(l_pad, 1)
    else:
        wa_main = _pad_to(w_arc[0], (d_pad, d_pad))
        wl_core = _pad_to(w_lab, (l_pad, d_pad, d_pad))
        wl_main = jnp.transpose(wl_core, (1, 0, 2)).reshape(d_pad, l_pad * d_pad)

    cdt = compute_dtype
    in_arrays = [arc_d.astype(cdt), arc_hT.astype(cdt),
                 lab_d.astype(cdt), lab_hT.astype(cdt),
                 wa_main.astype(cdt)]
    in_specs = [
        pl.BlockSpec((1, ts, d_pad), lambda bi, si, li: (bi, si, 0)),    # arc_d
        pl.BlockSpec((1, d_pad, s), lambda bi, si, li: (bi, 0, 0)),      # arc_hT
        pl.BlockSpec((1, ts, d_pad), lambda bi, si, li: (bi, si, 0)),    # lab_d
        pl.BlockSpec((1, d_pad, s), lambda bi, si, li: (bi, 0, 0)),      # lab_hT
        pl.BlockSpec((d_pad, d_pad), lambda bi, si, li: (0, 0)),         # wa_main
    ]
    if biased:
        in_arrays += [wa_d, wa_h, wa_c]
        in_specs += [
            pl.BlockSpec((d_pad, 1), lambda bi, si, li: (0, 0)),
            pl.BlockSpec((1, d_pad), lambda bi, si, li: (0, 0)),
            pl.BlockSpec((1, 1), lambda bi, si, li: (0, 0)),
        ]
    in_arrays += [wl_main.astype(cdt)]
    in_specs += [pl.BlockSpec((d_pad, tl * d_pad), lambda bi, si, li: (0, li))]
    if biased:
        in_arrays += [wl_d, wl_h, wl_c]
        in_specs += [
            pl.BlockSpec((tl, d_pad), lambda bi, si, li: (li, 0)),
            pl.BlockSpec((tl, d_pad), lambda bi, si, li: (li, 0)),
            pl.BlockSpec((tl, 1), lambda bi, si, li: (li, 0)),
        ]

    footprint = _biaffine_vmem_bytes(ts, tl, s, d_pad)
    vmem_limit = int(min(_vmem_cap_bytes(), max(footprint + (8 << 20), 32 << 20)))

    kernel = functools.partial(_biaffine_kernel, tl=tl, d=d_pad, biased=biased)
    arc_full, lab_full = pl.pallas_call(
        kernel,
        out_shape=(
            jax.ShapeDtypeStruct((b, s, s), jnp.float32),
            jax.ShapeDtypeStruct((b, l_pad, s, s), jnp.float32),
        ),
        grid=(b, n_st, n_lt),
        in_specs=in_specs,
        out_specs=(
            pl.BlockSpec((1, ts, s), lambda bi, si, li: (bi, si, 0)),
            pl.BlockSpec((1, tl, ts, s), lambda bi, si, li: (bi, li, si, 0)),
        ),
        compiler_params=pltpu.CompilerParams(
            # label-tile axis revisits the resident arc block -> "arbitrary";
            # batch and row-tile axes are megacore-parallel (matters on v7x).
            dimension_semantics=("parallel", "parallel", "arbitrary"),
            vmem_limit_bytes=vmem_limit),
    )(*in_arrays)
    return arc_full, lab_full          # (B,S,S), (B,L_pad,S,S) — padded, canonical


# -----------------------------------------------------------------------------
# Parameter construction (deterministic, xavier-uniform-like)
# -----------------------------------------------------------------------------
def _xavier(key, shape, fan_in, fan_out):
    bound = (6.0 / (fan_in + fan_out)) ** 0.5
    return jax.random.uniform(key, shape, jnp.float32, -bound, bound)


def make_params(key, enc_dim, input_size, num_labels, num_pos, biased):
    keys = jax.random.split(key, 8)
    win = input_size + 1 if biased else input_size
    return {
        "pos_w": _xavier(keys[0], (enc_dim, num_pos), enc_dim, num_pos),
        "pos_b": jnp.zeros((num_pos,), jnp.float32),
        "arc_h_w": _xavier(keys[1], (enc_dim, input_size), enc_dim, input_size),
        "arc_h_b": jnp.zeros((input_size,), jnp.float32),
        "arc_d_w": _xavier(keys[2], (enc_dim, input_size), enc_dim, input_size),
        "arc_d_b": jnp.zeros((input_size,), jnp.float32),
        "lab_h_w": _xavier(keys[3], (enc_dim, input_size), enc_dim, input_size),
        "lab_h_b": jnp.zeros((input_size,), jnp.float32),
        "lab_d_w": _xavier(keys[4], (enc_dim, input_size), enc_dim, input_size),
        "lab_d_b": jnp.zeros((input_size,), jnp.float32),
        "arc_bi_w": _xavier(keys[5], (1, win, win), win * win, win),
        "lab_bi_w": _xavier(keys[6], (num_labels, win, win),
                            win * win, num_labels * win),
    }


# -----------------------------------------------------------------------------
# BiAffineParser forward
# -----------------------------------------------------------------------------
@functools.partial(jax.jit, static_argnames=("biased", "use_bf16"))
def biaffine_parser_forward(params, inpt, *, biased: bool, use_bf16: bool = False):
    b, s, e = inpt.shape
    p = params["pos_w"].shape[1]
    d = params["arc_h_w"].shape[1]
    num_labels = params["lab_bi_w"].shape[0]

    s_pad = _round_up(s, 128 if s > 64 else 8)   # lane/sublane friendly sequence
    d_pad = _round_up(d, 128)                    # 128-aligned head width
    p_pad = _round_up(p, 128)
    cdt = jnp.bfloat16 if use_bf16 else jnp.float32

    # ---- fused head weights, ordered [arc_h|arc_d|lab_h|lab_d|pos] with all
    #      slice offsets 128-aligned (zero-padded columns are exact no-ops).
    def padw(w):
        return _pad_to(w, (e, d_pad))

    def padb(bv):
        return _pad_to(bv, (d_pad,))

    w_all = jnp.concatenate(
        [padw(params["arc_h_w"]), padw(params["arc_d_w"]),
         padw(params["lab_h_w"]), padw(params["lab_d_w"]),
         _pad_to(params["pos_w"], (e, p_pad))], axis=1)
    b_all = jnp.concatenate(
        [padb(params["arc_h_b"]), padb(params["arc_d_b"]),
         padb(params["lab_h_b"]), padb(params["lab_d_b"]),
         _pad_to(params["pos_b"], (p_pad,))], axis=0)

    x = _pad_to(inpt, (b, s_pad, e)).reshape(b * s_pad, e)
    heads = fused_linear_heads(x, w_all, b_all, compute_dtype=cdt)
    heads = heads.reshape(b, s_pad, 4 * d_pad + p_pad)

    arc_h = heads[..., 0:d_pad]
    arc_d = heads[..., d_pad:2 * d_pad]
    lab_h = heads[..., 2 * d_pad:3 * d_pad]
    lab_d = heads[..., 3 * d_pad:4 * d_pad]
    pos_scores = heads[:, :s, 4 * d_pad:4 * d_pad + p]

    # Pre-transpose the head-side activations once so the biaffine kernel runs
    # plain (TS,D)@(D,S) matmuls (no per-label transposed-RHS relayout).
    arc_hT = jnp.transpose(arc_h, (0, 2, 1))
    lab_hT = jnp.transpose(lab_h, (0, 2, 1))

    arc_full, lab_full = fused_biaffine(
        arc_d, arc_hT, lab_d, lab_hT,
        params["arc_bi_w"], params["lab_bi_w"],
        biased=biased, compute_dtype=cdt)

    arc_scores = arc_full[:, :s, :s]
    # TODO(synk): (B, L, S, S) is the kernel's lane-dense canonical layout; the
    # slice+transpose below exists only to honor the PyTorch 'bxyo' return
    # contract and should be folded into the downstream consumer when possible.
    lab_scores = jnp.transpose(lab_full[:, :num_labels, :s, :s], (0, 2, 3, 1))
    return pos_scores, arc_scores, lab_scores


# -----------------------------------------------------------------------------
# Pure-JAX reference (semantics check against the PyTorch forward)
# -----------------------------------------------------------------------------
def reference_forward(params, inpt, *, biased: bool):
    def lin(x, w, b):
        return x @ w + b

    def biaff(d, h, w):
        if biased:
            bb, ss, _ = d.shape
            ones = jnp.ones((bb, ss, 1), d.dtype)
            d = jnp.concatenate([d, ones], -1)
            h = jnp.concatenate([h, ones], -1)
        return jnp.einsum("bxi,oij,byj->bxyo", d, w, h)

    pos = lin(inpt, params["pos_w"], params["pos_b"])
    ah = lin(inpt, params["arc_h_w"], params["arc_h_b"])
    ad = lin(inpt, params["arc_d_w"], params["arc_d_b"])
    lh = lin(inpt, params["lab_h_w"], params["lab_h_b"])
    ld = lin(inpt, params["lab_d_w"], params["lab_d_b"])
    arc = jnp.squeeze(biaff(ad, ah, params["arc_bi_w"]), -1)
    lab = biaff(ld, lh, params["lab_bi_w"])
    return pos, arc, lab


if __name__ == "__main__":
    B, S = 2, 8              # batch, sequence length (num words)
    ENC = 32                 # encoder hidden size feeding the heads
    INPUT_SIZE = 32          # biaffine input_dim
    NUM_LABELS = 5
    NUM_POS = 6

    key = jax.random.PRNGKey(0)
    kp, kx = jax.random.split(key)
    inpt = jax.random.normal(kx, (B, S, ENC), jnp.float32)

    for biased in (True, False):
        params = make_params(kp, ENC, INPUT_SIZE, NUM_LABELS, NUM_POS, biased)
        pos_s, arc_s, lab_s = biaffine_parser_forward(params, inpt, biased=biased)
        jax.block_until_ready((pos_s, arc_s, lab_s))

        pos_r, arc_r, lab_r = reference_forward(params, inpt, biased=biased)
        assert pos_s.shape == (B, S, NUM_POS)
        assert arc_s.shape == (B, S, S)
        assert lab_s.shape == (B, S, S, NUM_LABELS)
        assert jnp.allclose(pos_s, pos_r, atol=1e-4, rtol=1e-4)
        assert jnp.allclose(arc_s, arc_r, atol=1e-4, rtol=1e-4)
        assert jnp.allclose(lab_s, lab_r, atol=1e-4, rtol=1e-4)

    print("KERNEL_OK")
</pallas_src>

<mosaic_0001>
module attributes {stable_mosaic.version = 11 : i64} {
  func.func @_fused_heads_kernel(%arg0: i32, %arg1: i32, %arg2: memref<16x32xf32, #tpu.memory_space<vmem>>, %arg3: memref<32x640xf32, #tpu.memory_space<vmem>>, %arg4: memref<1x640xf32, #tpu.memory_space<vmem>>, %arg5: memref<16x640xf32, #tpu.memory_space<vmem>>) attributes {dimension_semantics = [#tpu.dimension_semantics<parallel>, #tpu.dimension_semantics<parallel>], iteration_bounds = array<i64: 1, 1>, scalar_prefetch = 0 : i64, scratch_operands = 0 : i64, tpu.core_type = #tpu.core_type<tc>, window_params = [{transform_indices = @transform_0, window_bounds = array<i64: 16, 32>}, {transform_indices = @transform_1, window_bounds = array<i64: 32, 640>}, {transform_indices = @transform_2, window_bounds = array<i64: 1, 640>}, {transform_indices = @transform_3, window_bounds = array<i64: 16, 640>}]} {
    %c0 = arith.constant 0 : index
    %c0_0 = arith.constant 0 : index
    %0 = vector.load %arg2[%c0, %c0_0] : memref<16x32xf32, #tpu.memory_space<vmem>>, vector<16x32xf32>
    %c0_1 = arith.constant 0 : index
    %c0_2 = arith.constant 0 : index
    %1 = vector.load %arg3[%c0_1, %c0_2] : memref<32x640xf32, #tpu.memory_space<vmem>>, vector<32x640xf32>
    %cst = arith.constant dense<0.000000e+00> : vector<16x640xf32>
    %2 = tpu.matmul %0, %1, %cst {dimension_numbers = #tpu.dot_dimension_numbers<[1], [0], [0], [1], [0, 0, 1, 1], [], []>} : vector<16x32xf32>, vector<32x640xf32>, vector<16x640xf32> -> vector<16x640xf32>
    %c0_3 = arith.constant 0 : index
    %c0_4 = arith.constant 0 : index
    %3 = vector.load %arg4[%c0_3, %c0_4] : memref<1x640xf32, #tpu.memory_space<vmem>>, vector<1x640xf32>
    %4 = vector.broadcast %3 : vector<1x640xf32> to vector<16x640xf32>
    %5 = arith.addf %2, %4 : vector<16x640xf32>
    %c0_5 = arith.constant 0 : index
    %c0_6 = arith.constant 0 : index
    %6 = vector.load %arg5[%c0_5, %c0_6] : memref<16x640xf32, #tpu.memory_space<vmem>>, vector<16x640xf32>
    tpu.vector_store %arg5[%c0_5, %c0_6], %5 {strides = array<i32>} : memref<16x640xf32, #tpu.memory_space<vmem>>, vector<16x640xf32>,
    return
  }
  func.func @transform_0(%arg0: i32, %arg1: i32) -> (i32, i32) {
    %c0_i32 = arith.constant 0 : i32
    %c0_i32_0 = arith.constant 0 : i32
    return %arg1, %c0_i32 : i32, i32
  }
  func.func @transform_1(%arg0: i32, %arg1: i32) -> (i32, i32) {
    %c0_i32 = arith.constant 0 : i32
    %c0_i32_0 = arith.constant 0 : i32
    return %c0_i32, %arg0 : i32, i32
  }
  func.func @transform_2(%arg0: i32, %arg1: i32) -> (i32, i32) {
    %c0_i32 = arith.constant 0 : i32
    %c0_i32_0 = arith.constant 0 : i32
    return %c0_i32, %arg0 : i32, i32
  }
  func.func @transform_3(%arg0: i32, %arg1: i32) -> (i32, i32) {
    %c0_i32 = arith.constant 0 : i32
    return %arg1, %arg0 : i32, i32
  }
}

module attributes {stable_mosaic.version = 11 : i64} {
  func.func @_biaffine_kernel(%arg0: i32, %arg1: i32, %arg2: i32, %arg3: memref<1x8x128xf32, #tpu.memory_space<vmem>>, %arg4: memref<1x128x8xf32, #tpu.memory_space<vmem>>, %arg5: memref<1x8x128xf32, #tpu.memory_space<vmem>>, %arg6: memref<1x128x8xf32, #tpu.memory_space<vmem>>, %arg7: memref<128x128xf32, #tpu.memory_space<vmem>>, %arg8: memref<128x1xf32, #tpu.memory_space<vmem>>, %arg9: memref<1x128xf32, #tpu.memory_space<vmem>>, %arg10: memref<1x1xf32, #tpu.memory_space<vmem>>, %arg11: memref<128x640xf32, #tpu.memory_space<vmem>>, %arg12: memref<5x128xf32, #tpu.memory_space<vmem>>, %arg13: memref<5x128xf32, #tpu.memory_space<vmem>>, %arg14: memref<5x1xf32, #tpu.memory_space<vmem>>, %arg15: memref<1x8x8xf32, #tpu.memory_space<vmem>>, %arg16: memref<1x5x8x8xf32, #tpu.memory_space<vmem>>) attributes {dimension_semantics = [#tpu.dimension_semantics<parallel>, #tpu.dimension_semantics<parallel>, #tpu.dimension_semantics<arbitrary>], iteration_bounds = array<i64: 2, 1, 1>, scalar_prefetch = 0 : i64, scratch_operands = 0 : i64, tpu.core_type = #tpu.core_type<tc>, window_params = [{transform_indices = @transform_0, window_bounds = array<i64: 1, 8, 128>}, {transform_indices = @transform_1, window_bounds = array<i64: 1, 128, 8>}, {transform_indices = @transform_2, window_bounds = array<i64: 1, 8, 128>}, {transform_indices = @transform_3, window_bounds = array<i64: 1, 128, 8>}, {pipeline_mode = #tpu.pipeline_mode<synchronous>, transform_indices = @transform_4, window_bounds = array<i64: 128, 128>}, {pipeline_mode = #tpu.pipeline_mode<synchronous>, transform_indices = @transform_5, window_bounds = array<i64: 128, 1>}, {pipeline_mode = #tpu.pipeline_mode<synchronous>, transform_indices = @transform_6, window_bounds = array<i64: 1, 128>}, {pipeline_mode = #tpu.pipeline_mode<synchronous>, transform_indices = @transform_7, window_bounds = array<i64: 1, 1>}, {transform_indices = @transform_8, window_bounds = array<i64: 128, 640>}, {transform_indices = @transform_9, window_bounds = array<i64: 5, 128>}, {transform_indices = @transform_10, window_bounds = array<i64: 5, 128>}, {transform_indices = @transform_11, window_bounds = array<i64: 5, 1>}, {transform_indices = @transform_12, window_bounds = array<i64: 1, 8, 8>}, {transform_indices = @transform_13, window_bounds = array<i64: 1, 5, 8, 8>}]} {
    %c0 = arith.constant 0 : index
    %c0_0 = arith.constant 0 : index
    %c0_1 = arith.constant 0 : index
    %0 = vector.load %arg6[%c0, %c0_0, %c0_1] : memref<1x128x8xf32, #tpu.memory_space<vmem>>, vector<1x128x8xf32>
    %1 = vector.shape_cast %0 : vector<1x128x8xf32> to vector<128x8xf32>
    %c0_2 = arith.constant 0 : index
    %c0_3 = arith.constant 0 : index
    %c0_4 = arith.constant 0 : index
    %2 = vector.load %arg5[%c0_2, %c0_3, %c0_4] : memref<1x8x128xf32, #tpu.memory_space<vmem>>, vector<1x8x128xf32>
    %3 = vector.shape_cast %2 : vector<1x8x128xf32> to vector<8x128xf32>
    %c0_i32 = arith.constant 0 : i32
    %4 = arith.cmpi eq, %arg2, %c0_i32 : i32
    %5 = arith.extui %4 : i1 to i32
    %c0_i32_5 = arith.constant 0 : i32
    %6 = arith.cmpi ne, %5, %c0_i32_5 : i32
    scf.if %6 {
      %c0_37 = arith.constant 0 : index
      %c0_38 = arith.constant 0 : index
      %c0_39 = arith.constant 0 : index
      %71 = vector.load %arg3[%c0_37, %c0_38, %c0_39] : memref<1x8x128xf32, #tpu.memory_space<vmem>>, vector<1x8x128xf32>
      %72 = vector.shape_cast %71 : vector<1x8x128xf32> to vector<8x128xf32>
      %c0_40 = arith.constant 0 : index
      %c0_41 = arith.constant 0 : index
      %c0_42 = arith.constant 0 : index
      %73 = vector.load %arg4[%c0_40, %c0_41, %c0_42] : memref<1x128x8xf32, #tpu.memory_space<vmem>>, vector<1x128x8xf32>
      %74 = vector.shape_cast %73 : vector<1x128x8xf32> to vector<128x8xf32>
      %c0_43 = arith.constant 0 : index
      %c0_44 = arith.constant 0 : index
      %75 = vector.load %arg7[%c0_43, %c0_44] : memref<128x128xf32, #tpu.memory_space<vmem>>, vector<128x128xf32>
      %cst_45 = arith.constant dense<0.000000e+00> : vector<8x128xf32>
      %76 = tpu.matmul %72, %75, %cst_45 {dimension_numbers = #tpu.dot_dimension_numbers<[1], [0], [0], [1], [0, 0, 1, 1], [], []>} : vector<8x128xf32>, vector<128x128xf32>, vector<8x128xf32> -> vector<8x128xf32>
      %cst_46 = arith.constant dense<0.000000e+00> : vector<8x8xf32>
      %77 = tpu.matmul %76, %74, %cst_46 {dimension_numbers = #tpu.dot_dimension_numbers<[1], [0], [0], [1], [0, 0, 1, 1], [], []>} : vector<8x128xf32>, vector<128x8xf32>, vector<8x8xf32> -> vector<8x8xf32>
      %c0_47 = arith.constant 0 : index
      %c0_48 = arith.constant 0 : index
      %78 = vector.load %arg8[%c0_47, %c0_48] : memref<128x1xf32, #tpu.memory_space<vmem>>, vector<128x1xf32>
      %cst_49 = arith.constant dense<0.000000e+00> : vector<8x1xf32>
      %79 = tpu.matmul %72, %78, %cst_49 {dimension_numbers = #tpu.dot_dimension_numbers<[1], [0], [0], [1], [0, 0, 1, 1], [], []>} : vector<8x128xf32>, vector<128x1xf32>, vector<8x1xf32> -> vector<8x1xf32>
      %c0_50 = arith.constant 0 : index
      %c0_51 = arith.constant 0 : index
      %80 = vector.load %arg9[%c0_50, %c0_51] : memref<1x128xf32, #tpu.memory_space<vmem>>, vector<1x128xf32>
      %cst_52 = arith.constant dense<0.000000e+00> : vector<1x8xf32>
      %81 = tpu.matmul %80, %74, %cst_52 {dimension_numbers = #tpu.dot_dimension_numbers<[1], [0], [0], [1], [0, 0, 1, 1], [], []>} : vector<1x128xf32>, vector<128x8xf32>, vector<1x8xf32> -> vector<1x8xf32>
      %c0_53 = arith.constant 0 : index
      %c0_54 = arith.constant 0 : index
      %82 = vector.load %arg10[%c0_53, %c0_54] : memref<1x1xf32, #tpu.memory_space<vmem>>, vector<1x1xf32>
      %83 = vector.broadcast %82 : vector<1x1xf32> to vector<1x8xf32>
      %84 = arith.addf %81, %83 : vector<1x8xf32>
      %85 = vector.broadcast %79 : vector<8x1xf32> to vector<8x8xf32>
      %86 = arith.addf %77, %85 : vector<8x8xf32>
      %87 = vector.broadcast %84 : vector<1x8xf32> to vector<8x8xf32>
      %88 = arith.addf %86, %87 : vector<8x8xf32>
      %c0_55 = arith.constant 0 : index
      %c0_56 = arith.constant 0 : index
      %c0_57 = arith.constant 0 : index
      %89 = vector.load %arg15[%c0_55, %c0_56, %c0_57] : memref<1x8x8xf32, #tpu.memory_space<vmem>>, vector<1x8x8xf32>
      %90 = vector.shape_cast %89 : vector<1x8x8xf32> to vector<8x8xf32>
      %91 = vector.shape_cast %88 : vector<8x8xf32> to vector<1x8x8xf32>
      tpu.vector_store %arg15[%c0_55, %c0_56, %c0_57], %91 {strides = array<i32>} : memref<1x8x8xf32, #tpu.memory_space<vmem>>, vector<1x8x8xf32>,
    } else {
    }
    %c0_6 = arith.constant 0 : index
    %c0_7 = arith.constant 0 : index
    %7 = vector.load %arg11[%c0_6, %c0_7] : memref<128x640xf32, #tpu.memory_space<vmem>>, vector<128x640xf32>
    %cst = arith.constant dense<0.000000e+00> : vector<8x640xf32>
    %8 = tpu.matmul %3, %7, %cst {dimension_numbers = #tpu.dot_dimension_numbers<[1], [0], [0], [1], [0, 0, 1, 1], [], []>} : vector<8x128xf32>, vector<128x640xf32>, vector<8x640xf32> -> vector<8x640xf32>
    %c0_8 = arith.constant 0 : index
    %c0_9 = arith.constant 0 : index
    %9 = vector.load %arg12[%c0_8, %c0_9] : memref<5x128xf32, #tpu.memory_space<vmem>>, vector<5x128xf32>
    %cst_10 = arith.constant dense<0.000000e+00> : vector<8x5xf32>
    %10 = tpu.matmul %3, %9, %cst_10 {dimension_numbers = #tpu.dot_dimension_numbers<[1], [1], [0], [0], [0, 0, 1, 0], [], []>} : vector<8x128xf32>, vector<5x128xf32>, vector<8x5xf32> -> vector<8x5xf32>
    %c0_11 = arith.constant 0 : index
    %c0_12 = arith.constant 0 : index
    %11 = vector.load %arg13[%c0_11, %c0_12] : memref<5x128xf32, #tpu.memory_space<vmem>>, vector<5x128xf32>
    %cst_13 = arith.constant dense<0.000000e+00> : vector<5x8xf32>
    %12 = tpu.matmul %11, %1, %cst_13 {dimension_numbers = #tpu.dot_dimension_numbers<[1], [0], [0], [1], [0, 0, 1, 1], [], []>} : vector<5x128xf32>, vector<128x8xf32>, vector<5x8xf32> -> vector<5x8xf32>
    %c0_14 = arith.constant 0 : index
    %c0_15 = arith.constant 0 : index
    %13 = vector.load %arg14[%c0_14, %c0_15] : memref<5x1xf32, #tpu.memory_space<vmem>>, vector<5x1xf32>
    %14 = vector.broadcast %13 : vector<5x1xf32> to vector<5x8xf32>
    %15 = arith.addf %12, %14 : vector<5x8xf32>
    %16 = vector.extract_strided_slice %8 {offsets = [0, 0], sizes = [8, 128], strides = [1, 1]} : vector<8x640xf32> to vector<8x128xf32>
    %cst_16 = arith.constant dense<0.000000e+00> : vector<8x8xf32>
    %17 = tpu.matmul %16, %1, %cst_16 {dimension_numbers = #tpu.dot_dimension_numbers<[1], [0], [0], [1], [0, 0, 1, 1], [], []>} : vector<8x128xf32>, vector<128x8xf32>, vector<8x8xf32> -> vector<8x8xf32>
    %18 = vector.extract_strided_slice %10 {offsets = [0, 0], sizes = [8, 1], strides = [1, 1]} : vector<8x5xf32> to vector<8x1xf32>
    %19 = vector.broadcast %18 : vector<8x1xf32> to vector<8x8xf32>
    %20 = arith.addf %17, %19 : vector<8x8xf32>
    %21 = vector.extract_strided_slice %15 {offsets = [0, 0], sizes = [1, 8], strides = [1, 1]} : vector<5x8xf32> to vector<1x8xf32>
    %22 = vector.broadcast %21 : vector<1x8xf32> to vector<8x8xf32>
    %23 = arith.addf %20, %22 : vector<8x8xf32>
    %c0_17 = arith.constant 0 : index
    %c0_18 = arith.constant 0 : index
    %c0_19 = arith.constant 0 : index
    %c0_20 = arith.constant 0 : index
    %24 = vector.load %arg16[%c0_17, %c0_18, %c0_19, %c0_20] : memref<1x5x8x8xf32, #tpu.memory_space<vmem>>, vector<1x1x8x8xf32>
    %25 = vector.shape_cast %24 : vector<1x1x8x8xf32> to vector<8x8xf32>
    %26 = vector.shape_cast %23 : vector<8x8xf32> to vector<1x1x8x8xf32>
    tpu.vector_store %arg16[%c0_17, %c0_18, %c0_19, %c0_20], %26 {strides = array<i32>} : memref<1x5x8x8xf32, #tpu.memory_space<vmem>>, vector<1x1x8x8xf32>,
    %27 = vector.extract_strided_slice %8 {offsets = [0, 128], sizes = [8, 128], strides = [1, 1]} : vector<8x640xf32> to vector<8x128xf32>
    %cst_21 = arith.constant dense<0.000000e+00> : vector<8x8xf32>
    %28 = tpu.matmul %27, %1, %cst_21 {dimension_numbers = #tpu.dot_dimension_numbers<[1], [0], [0], [1], [0, 0, 1, 1], [], []>} : vector<8x128xf32>, vector<128x8xf32>, vector<8x8xf32> -> vector<8x8xf32>
    %29 = vector.extract_strided_slice %10 {offsets = [0, 1], sizes = [8, 1], strides = [1, 1]} : vector<8x5xf32> to vector<8x1xf32>
    %30 = vector.broadcast %29 : vector<8x1xf32> to vector<8x8xf32>
    %31 = arith.addf %28, %30 : vector<8x8xf32>
    %32 = vector.extract_strided_slice %15 {offsets = [1, 0], sizes = [1, 8], strides = [1, 1]} : vector<5x8xf32> to vector<1x8xf32>
    %33 = vector.broadcast %32 : vector<1x8xf32> to vector<8x8xf32>
    %34 = arith.addf %31, %33 : vector<8x8xf32>
    %c0_22 = arith.constant 0 : index
    %c1 = arith.constant 1 : index
    %c0_23 = arith.constant 0 : index
    %c0_24 = arith.constant 0 : index
    %35 = vector.load %arg16[%c0_22, %c1, %c0_23, %c0_24] : memref<1x5x8x8xf32, #tpu.memory_space<vmem>>, vector<1x1x8x8xf32>
    %36 = vector.shape_cast %35 : vector<1x1x8x8xf32> to vector<8x8xf32>
    %37 = vector.shape_cast %34 : vector<8x8xf32> to vector<1x1x8x8xf32>
    tpu.vector_store %arg16[%c0_22, %c1, %c0_23, %c0_24], %37 {strides = array<i32>} : memref<1x5x8x8xf32, #tpu.memory_space<vmem>>, vector<1x1x8x8xf32>,
    %38 = vector.extract_strided_slice %8 {offsets = [0, 256], sizes = [8, 128], strides = [1, 1]} : vector<8x640xf32> to vector<8x128xf32>
    %cst_25 = arith.constant dense<0.000000e+00> : vector<8x8xf32>
    %39 = tpu.matmul %38, %1, %cst_25 {dimension_numbers = #tpu.dot_dimension_numbers<[1], [0], [0], [1], [0, 0, 1, 1], [], []>} : vector<8x128xf32>, vector<128x8xf32>, vector<8x8xf32> -> vector<8x8xf32>
    %40 = vector.extract_strided_slice %10 {offsets = [0, 2], sizes = [8, 1], strides = [1, 1]} : vector<8x5xf32> to vector<8x1xf32>
    %41 = vector.broadcast %40 : vector<8x1xf32> to vector<8x8xf32>
    %42 = arith.addf %39, %41 : vector<8x8xf32>
    %43 = vector.extract_strided_slice %15 {offsets = [2, 0], sizes = [1, 8], strides = [1, 1]} : vector<5x8xf32> to vector<1x8xf32>
    %44 = vector.broadcast %43 : vector<1x8xf32> to vector<8x8xf32>
    %45 = arith.addf %42, %44 : vector<8x8xf32>
    %c0_26 = arith.constant 0 : index
    %c2 = arith.constant 2 : index
    %c0_27 = arith.constant 0 : index
    %c0_28 = arith.constant 0 : index
    %46 = vector.load %arg16[%c0_26, %c2, %c0_27, %c0_28] : memref<1x5x8x8xf32, #tpu.memory_space<vmem>>, vector<1x1x8x8xf32>
    %47 = vector.shape_cast %46 : vector<1x1x8x8xf32> to vector<8x8xf32>
    %48 = vector.shape_cast %45 : vector<8x8xf32> to vector<1x1x8x8xf32>
    tpu.vector_store %arg16[%c0_26, %c2, %c0_27, %c0_28], %48 {strides = array<i32>} : memref<1x5x8x8xf32, #tpu.memory_space<vmem>>, vector<1x1x8x8xf32>,
    %49 = vector.extract_strided_slice %8 {offsets = [0, 384], sizes = [8, 128], strides = [1, 1]} : vector<8x640xf32> to vector<8x128xf32>
    %cst_29 = arith.constant dense<0.000000e+00> : vector<8x8xf32>
    %50 = tpu.matmul %49, %1, %cst_29 {dimension_numbers = #tpu.dot_dimension_numbers<[1], [0], [0], [1], [0, 0, 1, 1], [], []>} : vector<8x128xf32>, vector<128x8xf32>, vector<8x8xf32> -> vector<8x8xf32>
    %51 = vector.extract_strided_slice %10 {offsets = [0, 3], sizes = [8, 1], strides = [1, 1]} : vector<8x5xf32> to vector<8x1xf32>
    %52 = vector.broadcast %51 : vector<8x1xf32> to vector<8x8xf32>
    %53 = arith.addf %50, %52 : vector<8x8xf32>
    %54 = vector.extract_strided_slice %15 {offsets = [3, 0], sizes = [1, 8], strides = [1, 1]} : vector<5x8xf32> to vector<1x8xf32>
    %55 = vector.broadcast %54 : vector<1x8xf32> to vector<8x8xf32>
    %56 = arith.addf %53, %55 : vector<8x8xf32>
    %c0_30 = arith.constant 0 : index
    %c3 = arith.constant 3 : index
    %c0_31 = arith.constant 0 : index
    %c0_32 = arith.constant 0 : index
    %57 = vector.load %arg16[%c0_30, %c3, %c0_31, %c0_32] : memref<1x5x8x8xf32, #tpu.memory_space<vmem>>, vector<1x1x8x8xf32>
    %58 = vector.shape_cast %57 : vector<1x1x8x8xf32> to vector<8x8xf32>
    %59 = vector.shape_cast %56 : vector<8x8xf32> to vector<1x1x8x8xf32>
    tpu.vector_store %arg16[%c0_30, %c3, %c0_31, %c0_32], %59 {strides = array<i32>} : memref<1x5x8x8xf32, #tpu.memory_space<vmem>>, vector<1x1x8x8xf32>,
    %60 = vector.extract_strided_slice %8 {offsets = [0, 512], sizes = [8, 128], strides = [1, 1]} : vector<8x640xf32> to vector<8x128xf32>
    %cst_33 = arith.constant dense<0.000000e+00> : vector<8x8xf32>
    %61 = tpu.matmul %60, %1, %cst_33 {dimension_numbers = #tpu.dot_dimension_numbers<[1], [0], [0], [1], [0, 0, 1, 1], [], []>} : vector<8x128xf32>, vector<128x8xf32>, vector<8x8xf32> -> vector<8x8xf32>
    %62 = vector.extract_strided_slice %10 {offsets = [0, 4], sizes = [8, 1], strides = [1, 1]} : vector<8x5xf32> to vector<8x1xf32>
    %63 = vector.broadcast %62 : vector<8x1xf32> to vector<8x8xf32>
    %64 = arith.addf %61, %63 : vector<8x8xf32>
    %65 = vector.extract_strided_slice %15 {offsets = [4, 0], sizes = [1, 8], strides = [1, 1]} : vector<5x8xf32> to vector<1x8xf32>
    %66 = vector.broadcast %65 : vector<1x8xf32> to vector<8x8xf32>
    %67 = arith.addf %64, %66 : vector<8x8xf32>
    %c0_34 = arith.constant 0 : index
    %c4 = arith.constant 4 : index
    %c0_35 = arith.constant 0 : index
    %c0_36 = arith.constant 0 : index
    %68 = vector.load %arg16[%c0_34, %c4, %c0_35, %c0_36] : memref<1x5x8x8xf32, #tpu.memory_space<vmem>>, vector<1x1x8x8xf32>
    %69 = vector.shape_cast %68 : vector<1x1x8x8xf32> to vector<8x8xf32>
    %70 = vector.shape_cast %67 : vector<8x8xf32> to vector<1x1x8x8xf32>
    tpu.vector_store %arg16[%c0_34, %c4, %c0_35, %c0_36], %70 {strides = array<i32>} : memref<1x5x8x8xf32, #tpu.memory_space<vmem>>, vector<1x1x8x8xf32>,
    return
  }
  func.func @transform_0(%arg0: i32, %arg1: i32, %arg2: i32) -> (i32, i32, i32) {
    %c0_i32 = arith.constant 0 : i32
    %c0_i32_0 = arith.constant 0 : i32
    return %arg0, %arg1, %c0_i32 : i32, i32, i32
  }
  func.func @transform_1(%arg0: i32, %arg1: i32, %arg2: i32) -> (i32, i32, i32) {
    %c0_i32 = arith.constant 0 : i32
    %c0_i32_0 = arith.constant 0 : i32
    %c0_i32_1 = arith.constant 0 : i32
    return %arg0, %c0_i32, %c0_i32_0 : i32, i32, i32
  }
  func.func @transform_2(%arg0: i32, %arg1: i32, %arg2: i32) -> (i32, i32, i32) {
    %c0_i32 = arith.constant 0 : i32
    %c0_i32_0 = arith.constant 0 : i32
    return %arg0, %arg1, %c0_i32 : i32, i32, i32
  }
  func.func @transform_3(%arg0: i32, %arg1: i32, %arg2: i32) -> (i32, i32, i32) {
    %c0_i32 = arith.constant 0 : i32
    %c0_i32_0 = arith.constant 0 : i32
    %c0_i32_1 = arith.constant 0 : i32
    return %arg0, %c0_i32, %c0_i32_0 : i32, i32, i32
  }
  func.func @transform_4(%arg0: i32, %arg1: i32, %arg2: i32) -> (i32, i32) {
    %c0_i32 = arith.constant 0 : i32
    %c0_i32_0 = arith.constant 0 : i32
    %c0_i32_1 = arith.constant 0 : i32
    return %c0_i32, %c0_i32_0 : i32, i32
  }
  func.func @transform_5(%arg0: i32, %arg1: i32, %arg2: i32) -> (i32, i32) {
    %c0_i32 = arith.constant 0 : i32
    %c0_i32_0 = arith.constant 0 : i32
    %c0_i32_1 = arith.constant 0 : i32
    return %c0_i32, %c0_i32_0 : i32, i32
  }
  func.func @transform_6(%arg0: i32, %arg1: i32, %arg2: i32) -> (i32, i32) {
    %c0_i32 = arith.constant 0 : i32
    %c0_i32_0 = arith.constant 0 : i32
    %c0_i32_1 = arith.constant 0 : i32
    return %c0_i32, %c0_i32_0 : i32, i32
  }
  func.func @transform_7(%arg0: i32, %arg1: i32, %arg2: i32) -> (i32, i32) {
    %c0_i32 = arith.constant 0 : i32
    %c0_i32_0 = arith.constant 0 : i32
    %c0_i32_1 = arith.constant 0 : i32
    return %c0_i32, %c0_i32_0 : i32, i32
  }
  func.func @transform_8(%arg0: i32, %arg1: i32, %arg2: i32) -> (i32, i32) {
    %c0_i32 = arith.constant 0 : i32
    %c0_i32_0 = arith.constant 0 : i32
    return %c0_i32, %arg2 : i32, i32
  }
  func.func @transform_9(%arg0: i32, %arg1: i32, %arg2: i32) -> (i32, i32) {
    %c0_i32 = arith.constant 0 : i32
    %c0_i32_0 = arith.constant 0 : i32
    return %arg2, %c0_i32 : i32, i32
  }
  func.func @transform_10(%arg0: i32, %arg1: i32, %arg2: i32) -> (i32, i32) {
    %c0_i32 = arith.constant 0 : i32
    %c0_i32_0 = arith.constant 0 : i32
    return %arg2, %c0_i32 : i32, i32
  }
  func.func @transform_11(%arg0: i32, %arg1: i32, %arg2: i32) -> (i32, i32) {
    %c0_i32 = arith.constant 0 : i32
    %c0_i32_0 = arith.constant 0 : i32
    return %arg2, %c0_i32 : i32, i32
  }
  func.func @transform_12(%arg0: i32, %arg1: i32, %arg2: i32) -> (i32, i32, i32) {
    %c0_i32 = arith.constant 0 : i32
    %c0_i32_0 = arith.constant 0 : i32
    return %arg0, %arg1, %c0_i32 : i32, i32, i32
  }
  func.func @transform_13(%arg0: i32, %arg1: i32, %arg2: i32) -> (i32, i32, i32, i32) {
    %c0_i32 = arith.constant 0 : i32
    %c0_i32_0 = arith.constant 0 : i32
    return %arg0, %arg2, %arg1, %c0_i32 : i32, i32, i32, i32
  }
}

</mosaic_0001>

<bundles_post_ra>
// kernel: custom-call
= control target key start
LH: loop header
LB: loop body
LE: loop exit
PB: predicated region body
PF: predicated region fallthrough
CT: control target
= control target key end

     0   :  { %s6_s0 = inlined_call_operand.vmem [shape: f32[640], index: 0, kind: output, shape index: {}]  }

// kernel: biaffine_parser_forward.2
= control target key start
LH: loop header
LB: loop body
LE: loop exit
PB: predicated region body
PF: predicated region fallthrough
CT: control target
= control target key end

     0   :  { %v337_v3 = vmov 0.0   ;;  %vm63_vm0 = vcmask 261120   ;;  %v38_v23 = vlaneseq  ;;  %s463_s1 = inlined_call_operand.vmem [shape: f32[32,640], index: 1, kind: input, shape index: {}]   ;;  %s464_s0 = inlined_call_operand.vmem [shape: f32[16,32], index: 0, kind: input, shape index: {}]   ;;  %s465_s2 = inlined_call_operand.vmem [shape: f32[1,640], index: 2, kind: input, shape index: {}]   ;;  %s466_s3 = inlined_call_operand.vmem [shape: f32[16,640], index: 3, kind: output, shape index: {}]  }
   0x1   :  { %v32_v0 = vld [vmem:[%s463_s1 + $0x80] sm:$0xff]  ;;  %v31_v1 = vld [vmem:[%s463_s1 + $0x78] sm:$0xff]  ;;  %134 = vmatprep.mubr.f32.mxu0 %v337_v3  ;;  %211 = vmatprep.mubr.f32.mxu1 %v337_v3  ;;  %v26_v4 = vld [vmem:[%s463_s1 + $0x50] sm:$0xff] }
   0x2   :  { %v27_v2 = vld [vmem:[%s463_s1 + $0x58] sm:$0xff]  ;;  %94 = vmatprep.subr.mxu0 %v32_v0  ;;  %v34_v5 = vld [vmem:[%s463_s1 + $0x90] sm:$0xff]  ;;  %v33_v7 = vld [vmem:[%s463_s1 + $0x88] sm:$0xff]  ;;  %v39_v24 = vshrl.u32 %v38_v23, 7 }
   0x3   :  { %95 = vmatpush1.msra.mxu0 %v31_v1  ;;  %171 = vmatprep.subr.mxu1 %v34_v5  ;;  %v22_v6 = vld [vmem:[%s463_s1 + $0x30] sm:$0xff]  ;;  %v29_v8 = vld [vmem:[%s463_s1 + $0x68] sm:$0xff]  ;;  %v28_v10 = vld [vmem:[%s463_s1 + $0x60] sm:$0xff] }
   0x4   :  { %96 = vmatprep.subr.mxu0 %v27_v2  ;;  %172 = vmatpush1.msra.mxu1 %v33_v7  ;;  %v21_v9 = vld [vmem:[%s463_s1 + $0x28] sm:$0xff]  ;;  %v24_v12 = vld [vmem:[%s463_s1 + $0x40] sm:$0xff]  ;;  %v23_v13 = vld [vmem:[%s463_s1 + $0x38] sm:$0xff]  ;;  %v40_v25 = vsub.s32 0, %v39_v24  ;;  %v44_v27 = vsub.s32 1, %v39_v24  ;;  %v48_v28 = vsub.s32 2, %v39_v24 }
   0x5   :  { %97 = vmatpush1.msra.mxu0 %v26_v4  ;;  %173 = vmatprep.subr.mxu1 %v29_v8  ;;  %v17_v11 = vld [vmem:[%s463_s1 + $0x8] sm:$0xff]  ;;  %v16_v14 = vld [vmem:[%s463_s1] sm:$0xff]  ;;  %v19_v15 = vld [vmem:[%s463_s1 + $0x18] sm:$0xff]  ;;  %v52_v30 = vsub.s32 3, %v39_v24  ;;  %v56_v35 = vsub.s32 4, %v39_v24 }
   0x6   :  { %98 = vmatprep.subr.mxu0 %v22_v6  ;;  %174 = vmatpush1.msra.mxu1 %v28_v10  ;;  %v14_v16 = vld [vmem:[%s464_s0] sm:$0xff]  ;;  %v35_v17 = vld [vmem:[%s463_s1 + $0x98] sm:$0xff]  ;;  %v18_v18 = vld [vmem:[%s463_s1 + $0x10] sm:$0xff] }
   0x7   :  { %99 = vmatpush1.msra.mxu0 %v21_v9  ;;  %175 = vmatprep.subr.mxu1 %v24_v12  ;;  %v30_v19 = vld [vmem:[%s463_s1 + $0x70] sm:$0xff]  ;;  %v15_v20 = vld [vmem:[%s464_s0 + $0x8] sm:$0xff]  ;;  %v20_v22 = vld [vmem:[%s463_s1 + $0x20] sm:$0xff] }
   0x8   :  { %100 = vmatprep.subr.mxu0 %v17_v11  ;;  %176 = vmatpush1.msra.mxu1 %v23_v13  ;;  %v25_v21 = vld [vmem:[%s463_s1 + $0x48] sm:$0xff]  ;;  %v36_v26 = vld [vmem:[%s465_s2] sm:$0x1f] }
   0x9   :  { %101 = vmatpush1.msra.mxu0 %v16_v14  ;;  %177 = vmatprep.subr.mxu1 %v19_v15  ;;  %v41_v29 = vrot.slane %v36_v26, %v40_v25  ;;  %v45_v31 = vrot.slane %v36_v26, %v44_v27  ;;  %v49_v33 = vrot.slane %v36_v26, %v48_v28 }
   0xa   :  { %313 = vmatmul.mubr.msk.f32.vlgmr.msra.gmra.mxu0 %vm63_vm0, %v14_v16  ;;  %325 = vmatprep.subr.mxu0 %v35_v17  ;;  %v53_v37 = vrot.slane %v36_v26, %v52_v30  ;;  %v57_v44 = vrot.slane %v36_v26, %v56_v35 }
   0xb   :  { %326 = vmatpush3.msra.mxu0 %v35_v17  ;;  %178 = vmatpush1.msra.mxu1 %v18_v18 }
   0xc   :  { %327 = vmatprep.subr.mxu0 %v30_v19  ;;  %140 = vmatprep.mubr.f32.mxu0 %v337_v3 }
   0xd   :  { %315 = vmatmul.mubr.msk.f32.vlgmr.msra.gmra.mxu1 %vm63_vm0, %v14_v16  ;;  %328 = vmatpush3.msra.mxu0 %v30_v19 }
   0xe   :  { %314 = vmatmul.mubr.msk.f32.gmra.mxu0 %vm63_vm0, %v15_v20  ;;  %329 = vmatprep.subr.mxu0 %v25_v21 }
   0xf   :  { %330 = vmatpush3.msra.mxu0 %v25_v21  ;;  %217 = vmatprep.mubr.f32.mxu1 %v337_v3 }
  0x10   :  { %331 = vmatprep.subr.mxu0 %v20_v22  ;;  %333 = vmatprep.mubr.msk.f32.mxu0 %vm63_vm0, %v14_v16 }
  0x11   :  { %316 = vmatmul.mubr.msk.f32.gmra.mxu1 %vm63_vm0, %v15_v20  ;;  %332 = vmatpush3.msra.mxu0 %v20_v22 }
  0x12   :  { %334 = vmatmul.mubr.msk.f32.vlgmr.msra.gmra.mxu0 %vm63_vm0, %v15_v20 }
  0xca   :  { %v136_v32 = vpop.f32.mrf.mxu0 }
  0xcb   :  { %v137_v34 = vadd.f32 %v136_v32, %v41_v29 }
  0xcc   :  { %v138_v36 = vpop.f32.mrf.mxu0 }
  0xcd   :  { %299 = vst [vmem:[%s466_s3] sm:$0xff] %v137_v34  ;;  %v139_v38 = vadd.f32 %v138_v36, %v45_v31  ;;  %v213_v39 = vpop.f32.mrf.mxu1 }
  0xce   :  { %v214_v40 = vadd.f32 %v213_v39, %v49_v33  ;;  %v142_v41 = vpop.f32.mrf.mxu0 }
  0xcf   :  { %300 = vst [vmem:[%s466_s3 + $0x8] sm:$0xff] %v139_v38  ;;  %v143_v42 = vadd.f32 %v142_v41, %v41_v29  ;;  %v215_v43 = vpop.f32.mrf.mxu1 }
  0xd0   :  { %301 = vst [vmem:[%s466_s3 + $0x10] sm:$0xff] %v214_v40  ;;  %v216_v45 = vadd.f32 %v215_v43, %v53_v37  ;;  %v144_v46 = vpop.f32.mrf.mxu0 }
  0xd1   :  { %304 = vst [vmem:[%s466_s3 + $0x28] sm:$0xff] %v143_v42  ;;  %v145_v47 = vadd.f32 %v144_v46, %v45_v31  ;;  %v219_v48 = vpop.f32.mrf.mxu1 }
  0xd2   :  { %302 = vst [vmem:[%s466_s3 + $0x18] sm:$0xff] %v216_v45  ;;  %v220_v49 = vadd.f32 %v219_v48, %v49_v33  ;;  %v335_v50 = vpop.f32.mrf.mxu0 }
  0xd3   :  { %305 = vst [vmem:[%s466_s3 + $0x30] sm:$0xff] %v145_v47  ;;  %v296_v51 = vadd.f32 %v335_v50, %v57_v44  ;;  %v221_v52 = vpop.f32.mrf.mxu1 }
  0xd4   :  { %306 = vst [vmem:[%s466_s3 + $0x38] sm:$0xff] %v220_v49  ;;  %v222_v53 = vadd.f32 %v221_v52, %v53_v37  ;;  %v290_v54 = vpop.f32.mrf.mxu0 }
  0xd5   :  { %308 = vst [vmem:[%s466_s3 + $0x48] sm:$0xff] %v296_v51  ;;  %v291_v55 = vadd.f32 %v290_v54, %v57_v44 }
  0xd6   :  { %307 = vst [vmem:[%s466_s3 + $0x40] sm:$0xff] %v222_v53 }
  0xd7   :  { %303 = vst [vmem:[%s466_s3 + $0x20] sm:$0xff] %v291_v55 }

// kernel: biaffine_parser_forward.3
= control target key start
LH: loop header
LB: loop body
LE: loop exit
PB: predicated region body
PF: predicated region fallthrough
CT: control target
= control target key end

     0   :  { %s3874_s0 = inlined_call_operand.vmem [shape: f32[2,8,128], index: 0, kind: input, shape index: {}]   ;;  %s3875_s1 = inlined_call_operand.vmem [shape: f32[2,128,8], index: 1, kind: input, shape index: {}]   ;;  %s3876_s2 = inlined_call_operand.vmem [shape: f32[2,8,128], index: 2, kind: input, shape index: {}]   ;;  %s3877_s3 = inlined_call_operand.vmem [shape: f32[2,128,8], index: 3, kind: input, shape index: {}]   ;;  %s3878_s4 = inlined_call_operand.vmem [shape: f32[128,128], index: 4, kind: input, shape index: {}]   ;;  %s3879_s5 = inlined_call_operand.vmem [shape: f32[128,1], index: 5, kind: input, shape index: {}]   ;;  %s3880_s6 = inlined_call_operand.vmem [shape: f32[1,128], index: 6, kind: input, shape index: {}]   ;;  %s3881_s7 = inlined_call_operand.<no memory space> [shape: f32[1,1], index: 7, kind: input, shape index: {}]   ;;  %s3882_s8 = inlined_call_operand.vmem [shape: f32[128,640], index: 8, kind: input, shape index: {}]   ;;  %s3883_s9 = inlined_call_operand.vmem [shape: f32[5,128], index: 9, kind: input, shape index: {}]   ;;  %s3884_s10 = inlined_call_operand.vmem [shape: f32[5,128], index: 10, kind: input, shape index: {}]   ;;  %s3885_s11 = inlined_call_operand.vmem [shape: f32[5,1], index: 11, kind: input, shape index: {}]   ;;  %s3886_s12 = inlined_call_operand.hbm [shape: f32[2,8,8], index: 12, kind: output, shape index: {0}]   ;;  %s3887_s13 = inlined_call_operand.hbm [shape: f32[2,5,8,8], index: 13, kind: output, shape index: {1}]  }
   0x1   :  { %3892 = sst [smem:[#allocation13_spill]] %s3874_s0  ;;  %v19_v0 = vstv %s3881_s7 }
   0x2   :  { %3893 = sst [smem:[#allocation14_spill]] %s3875_s1  ;;  %20 = vst [vmem:[#allocation2] sm:$0x1] %v19_v0 }
   0x3   :  { %21 = vsyncpa [#allocation4], 0 }
   0x4   :  { %23 = vsyncpa [#allocation4 + $0x1], 0 }
   0x5   :  { %24 = vsyncpa [#allocation6], 0 }
   0x6   :  { %26 = vsyncpa [#allocation6 + $0x1], 0  ;;  %s2969_s27 = smov 0   ;;  %s2971_s28 = smov 0  }
   0x7   :  { %s2973_s29 = smov 0   ;;  %s2975_s30 = smov 0  }
   0x8   :  { %s2977_s14 = smov 0   ;;  %s2979_s15 = smov 0  }
   0x9 LB: > { %3894 = sst [smem:[#allocation9_spill]] %s2871_s29  ;;  %s2094_s7 = sadd.s32 4294967295, %s2883_s15   ;;  %s2883_s15 = sphi %s2979_s15, %s32_s15   ;;  %s2879_s14 = sphi %s2977_s14, %s3906_s14   ;;  %s2875_s30 = sphi %s2975_s30, %s3905_s30   ;;  %s2871_s29 = sphi %s2973_s29, %s3904_s29   ;;  %s2867_s28 = sphi %s2971_s28, %s3908_s28   ;;  %s2863_s27 = sphi %s2969_s27, %s3907_s27  }
   0xa   : > { %3895 = sst [smem:[#allocation10_spill]] %s2879_s14  ;;  %s2095_s16 = sadd.s32 4294967294, %s2883_s15  }
   0xb   : > { %s51_s17 = sadd.s32 1, %s2879_s14  ;;  %s356_s18 = sadd.s32 1, %s2871_s29 }
   0xc   : > { %p53_p0 = scmp.ge.s32.totalorder %s51_s17, 2  ;;  %p366_p1 = scmp.ne.s32.totalorder %s2871_s29, %s2867_s28 }
   0xd   : > { %p367_p2 = scmp.eq.s32.totalorder %s2094_s7, 1  ;;  %p372_p3 = scmp.ne.s32.totalorder %s2867_s28, %s2863_s27 }
   0xe   : > { %s3910_s17 = smov (%p53_p0, %s51_s17), 0  ;;  %p373_p5 = scmp.eq.s32.totalorder %s2095_s16, 1 }
   0xf   : > { %3896 = sst [smem:[#allocation11_spill]] %s3910_s17  ;;  %p3009_p4 = por %p367_p2, %p366_p1 }
  0x10   : > { %s351_s20 = ssub.s32 %s2879_s14, %s3910_s17  ;;  %p2102_p6 = scmp.ge.s32.totalorder %s2883_s15, 1 }
  0x11   : > { %p354_p7 = scmp.eq.s32.totalorder %s351_s20, 0  ;;  %p3016_p8 = por %p373_p5, %p372_p3 }
  0x12   : > { %p499_p9 = scmp.lt.s32.totalorder %s2883_s15, 3 }
  0x13   : > { %s3022_s22 = scalar_select %p354_p7, %s2871_s29, %s356_s18  }
  0x14   : > { %p500_p10 = pnand %p2102_p6, %p499_p9 }
  0x15   : > { %3899 = sst [smem:[#allocation12_spill]] %s3022_s22  ;;  %p584_p11 = scmp.lt.s32.totalorder (!%p500_p10), %s2875_s30, 1 }
  0x16   : > { %503 = sbr.rel (%p500_p10) target bundleno = 721 (0x2d1), region = 68  ;;  %s3900_s0 = sld [smem:[#allocation13_spill]] (!%p500_p10) }
  0x17   : > { %s3901_s1 = sld [smem:[#allocation14_spill]] (!%p500_p10)  ;;  %s3749_s29 = sand.u32 (!%p500_p10), 1, %s2867_s28  }
  0x18   : > { %s2103_s22 = sshll.u32 (!%p500_p10), %s3749_s29, 3  ;;  %s2115_s16 = sshll.u32 (!%p500_p10), %s2875_s30, 7 }
  0x19   : > { %s1847_s24 = scalar_lea.sflag (!%p500_p10), [#allocation4], %s3749_s29 }
  0x1b   : > { %v680_v1 = vld [vmem:[%s3878_s4 + $0x78] sm:$0xff]  ;;  %v2885_v2 = vmov 0.0   ;;  %v679_v3 = vld [vmem:[%s3878_s4 + $0x70] sm:$0xff]  ;;  %vm2886_vm0 = vmmov 0   ;;  %v678_v4 = vld [vmem:[%s3878_s4 + $0x68] sm:$0xff]  ;;  %s3108_s23 = scalar_select %p584_p11, %s2875_s30, 1 }
  0x1c   : > { %2310 = vmatprep.subr.mxu0 %v2885_v2  ;;  %2342 = vmatprep.mubr.msk.f32.mxu0 %vm2886_vm0, %v2885_v2  ;;  %v677_v5 = vld [vmem:[%s3878_s4 + $0x60] sm:$0xff]  ;;  %v766_v6 = vld [vmem:[%s3879_s5 + $0x78] sm:$0xff]  ;;  %v765_v7 = vld [vmem:[%s3879_s5 + $0x70] sm:$0xff]  ;;  %vm998_vm1 = vcmask 64512  }
  0x1d   : > { %2311 = vmatpush3.msra.mxu0 %v680_v1  ;;  %2345 = vmatprep.subr.mxu1 %v2885_v2  ;;  %v676_v8 = vld [vmem:[%s3878_s4 + $0x58] sm:$0xff]  ;;  %v764_v9 = vld [vmem:[%s3879_s5 + $0x68] sm:$0xff]  ;;  %v675_v10 = vld [vmem:[%s3878_s4 + $0x50] sm:$0xff]  ;;  %s2104_s25 = sshll.u32 %s3108_s23, 3  ;;  %s3891_s17 = sshll.u32 %s3108_s23, 7 }
  0x1e   : > { %2312 = vmatprep.subr.mxu0 %v2885_v2  ;;  %2377 = vmatprep.mubr.msk.f32.mxu1 %vm2886_vm0, %v2885_v2  ;;  %v763_v11 = vld [vmem:[%s3879_s5 + $0x60] sm:$0xff]  ;;  %v674_v12 = vld [vmem:[%s3878_s4 + $0x48] sm:$0xff]  ;;  %v762_v13 = vld [vmem:[%s3879_s5 + $0x58] sm:$0xff]  ;;  %s590_s7 = scalar_lea.vmem %s3900_s0, %s2104_s25  ;;  %s3158_s14 = scalar_lea.vmem %s3901_s1, %s3891_s17 }
  0x1f   : > { %2313 = vmatpush3.msra.mxu0 %v679_v3  ;;  %2346 = vmatpush3.msra.mxu1 %v766_v6  ;;  %v673_v14 = vld [vmem:[%s3878_s4 + $0x40] sm:$0xff]  ;;  %v761_v15 = vld [vmem:[%s3879_s5 + $0x50] sm:$0xff]  ;;  %v672_v16 = vld [vmem:[%s3878_s4 + $0x38] sm:$0xff]  ;;  %s3902_s20 = sshll.u32 %s3108_s23, 7  ;;  %s3754_s17 = scalar_lea.vmem [#allocation3], %s2103_s22 }
  0x20   : > { %2314 = vmatprep.subr.mxu0 %v2885_v2  ;;  %2347 = vmatprep.subr.mxu1 %v2885_v2  ;;  %v760_v17 = vld [vmem:[%s3879_s5 + $0x48] sm:$0xff]  ;;  %v671_v18 = vld [vmem:[%s3878_s4 + $0x30] sm:$0xff]  ;;  %v759_v19 = vld [vmem:[%s3879_s5 + $0x40] sm:$0xff]  ;;  %s3407_s26 = scalar_lea.vmem %s3877_s3, %s3902_s20  ;;  %s2892_s23 = smov [#allocation3]  }
  0x21   : > { %2315 = vmatpush3.msra.mxu0 %v678_v4  ;;  %2348 = vmatpush3.msra.mxu1 %v765_v7  ;;  %v670_v20 = vld [vmem:[%s3878_s4 + $0x28] sm:$0xff]  ;;  %v758_v21 = vld [vmem:[%s3879_s5 + $0x38] sm:$0xff]  ;;  %v669_v22 = vld [vmem:[%s3878_s4 + $0x20] sm:$0xff]  ;;  %s2781_s0 = sshll.u32 %s2892_s23, 4  ;;  %s2782_s0 = int_to_ptr.vmem [resolvable:$false] %s2781_s0 }
  0x22   : > { %2316 = vmatprep.subr.mxu0 %v2885_v2  ;;  %2349 = vmatprep.subr.mxu1 %v2885_v2  ;;  %v757_v23 = vld [vmem:[%s3879_s5 + $0x30] sm:$0xff]  ;;  %v668_v24 = vld [vmem:[%s3878_s4 + $0x18] sm:$0xff]  ;;  %v756_v25 = vld [vmem:[%s3879_s5 + $0x28] sm:$0xff] }
  0x23   : > { %2317 = vmatpush3.msra.mxu0 %v677_v5  ;;  %2350 = vmatpush3.msra.mxu1 %v764_v9  ;;  %v667_v26 = vld [vmem:[%s3878_s4 + $0x10] sm:$0xff]  ;;  %v755_v27 = vld [vmem:[%s3879_s5 + $0x20] sm:$0xff]  ;;  %v666_v28 = vld [vmem:[%s3878_s4 + $0x8] sm:$0xff] }
  0x24   : > { %2318 = vmatprep.subr.mxu0 %v2885_v2  ;;  %2351 = vmatprep.subr.mxu1 %v2885_v2  ;;  %v754_v29 = vld [vmem:[%s3879_s5 + $0x18] sm:$0xff]  ;;  %v665_v30 = vld [vmem:[%s3878_s4] sm:$0xff]  ;;  %v753_v31 = vld [vmem:[%s3879_s5 + $0x10] sm:$0xff] }
  0x25   : > { %2319 = vmatpush3.msra.mxu0 %v676_v8  ;;  %2352 = vmatpush3.msra.mxu1 %v763_v11  ;;  %v648_v32 = vld [vmem:[%s590_s7] sm:$0xff]  ;;  %v752_v33 = vld [vmem:[%s3879_s5 + $0x8] sm:$0xff]  ;;  %v664_v34 = vld [vmem:[%s3158_s14 + $0x78] sm:$0xff]  ;;  %s1864_s7 = scalar_lea.hbm %s3886_s12, %s2115_s16 }
  0x26   : > { %2320 = vmatprep.subr.mxu0 %v2885_v2  ;;  %2353 = vmatprep.subr.mxu1 %v2885_v2  ;;  %v751_v35 = vld [vmem:[%s3879_s5] sm:$0xff]  ;;  %v663_v36 = vld [vmem:[%s3158_s14 + $0x70] sm:$0xff]  ;;  %v662_v37 = vld [vmem:[%s3158_s14 + $0x68] sm:$0xff] }
  0x27   : > { %2321 = vmatpush3.msra.mxu0 %v675_v10  ;;  %2354 = vmatpush3.msra.mxu1 %v762_v13  ;;  %v661_v38 = vld [vmem:[%s3158_s14 + $0x60] sm:$0xff]  ;;  %v660_v39 = vld [vmem:[%s3158_s14 + $0x58] sm:$0xff]  ;;  %v659_v40 = vld [vmem:[%s3158_s14 + $0x50] sm:$0xff] }
  0x28   : > { %2322 = vmatprep.subr.mxu0 %v2885_v2  ;;  %2355 = vmatprep.subr.mxu1 %v2885_v2  ;;  %v658_v41 = vld [vmem:[%s3158_s14 + $0x48] sm:$0xff]  ;;  %v657_v42 = vld [vmem:[%s3158_s14 + $0x40] sm:$0xff]  ;;  %v656_v43 = vld [vmem:[%s3158_s14 + $0x38] sm:$0xff] }
  0x29   : > { %2323 = vmatpush3.msra.mxu0 %v674_v12  ;;  %2356 = vmatpush3.msra.mxu1 %v761_v15  ;;  %v655_v44 = vld [vmem:[%s3158_s14 + $0x30] sm:$0xff]  ;;  %v654_v45 = vld [vmem:[%s3158_s14 + $0x28] sm:$0xff]  ;;  %v653_v46 = vld [vmem:[%s3158_s14 + $0x20] sm:$0xff] }
  0x2a   : > { %2324 = vmatprep.subr.mxu0 %v2885_v2  ;;  %2357 = vmatprep.subr.mxu1 %v2885_v2  ;;  %v652_v47 = vld [vmem:[%s3158_s14 + $0x18] sm:$0xff]  ;;  %v651_v48 = vld [vmem:[%s3158_s14 + $0x10] sm:$0xff]  ;;  %v650_v49 = vld [vmem:[%s3158_s14 + $0x8] sm:$0xff] }
  0x2b   : > { %2325 = vmatpush3.msra.mxu0 %v673_v14  ;;  %2358 = vmatpush3.msra.mxu1 %v760_v17  ;;  %v649_v50 = vld [vmem:[%s3158_s14] sm:$0xff]  ;;  %v1075_v53 = vld [vmem:[%s3882_s8 + $0x258] sm:$0xff]  ;;  %v1070_v55 = vld [vmem:[%s3882_s8 + $0x230] sm:$0xff]  ;;  %s602_s14 = scalar_lea.vmem %s3876_s2, %s2104_s25  ;;  %s2783_s25 = scalar_lea.vmem %s2782_s0, 256 }
  0x2c   : > { %2326 = vmatprep.subr.mxu0 %v2885_v2  ;;  %2359 = vmatprep.subr.mxu1 %v2885_v2  ;;  %v1076_v51 = vld [vmem:[%s3882_s8 + $0x260] sm:$0xff]  ;;  %v1071_v54 = vld [vmem:[%s3882_s8 + $0x238] sm:$0xff]  ;;  %v1066_v56 = vld [vmem:[%s3882_s8 + $0x210] sm:$0xff] }
  0x2d   : > { %2327 = vmatpush3.msra.mxu0 %v672_v16  ;;  %2360 = vmatpush3.msra.mxu1 %v759_v19  ;;  %v837_v52 = vld [vmem:[%s3880_s6] sm:$0x1]  ;;  %v1065_v57 = vld [vmem:[%s3882_s8 + $0x208] sm:$0xff]  ;;  %v1055_v61 = vld [vmem:[%s3882_s8 + $0x1b8] sm:$0xff] }
  0x2e   : > { %2328 = vmatprep.subr.mxu0 %v2885_v2  ;;  %2361 = vmatprep.subr.mxu1 %v2885_v2  ;;  %v1061_v58 = vld [vmem:[%s3882_s8 + $0x1e8] sm:$0xff]  ;;  %v1060_v59 = vld [vmem:[%s3882_s8 + $0x1e0] sm:$0xff]  ;;  %v1051_v62 = vld [vmem:[%s3882_s8 + $0x198] sm:$0xff] }
  0x2f   : > { %2329 = vmatpush3.msra.mxu0 %v671_v18  ;;  %2362 = vmatpush3.msra.mxu1 %v758_v21  ;;  %v1056_v60 = vld [vmem:[%s3882_s8 + $0x1c0] sm:$0xff]  ;;  %v1050_v63 = vld [vmem:[%s3882_s8 + $0x190] sm:$0xff]  ;;  %v1045_v1 = vld [vmem:[%s3882_s8 + $0x168] sm:$0xff] }
  0x30   : > { %2330 = vmatprep.subr.mxu0 %v2885_v2  ;;  %2363 = vmatprep.subr.mxu1 %v2885_v2  ;;  %v1046_v0 = vld [vmem:[%s3882_s8 + $0x170] sm:$0xff]  ;;  %v1041_v3 = vld [vmem:[%s3882_s8 + $0x148] sm:$0xff]  ;;  %v1040_v4 = vld [vmem:[%s3882_s8 + $0x140] sm:$0xff] }
  0x31   : > { %2331 = vmatpush3.msra.mxu0 %v670_v20  ;;  %2364 = vmatpush3.msra.mxu1 %v757_v23  ;;  %v1036_v5 = vld [vmem:[%s3882_s8 + $0x120] sm:$0xff]  ;;  %v1035_v6 = vld [vmem:[%s3882_s8 + $0x118] sm:$0xff]  ;;  %v1030_v8 = vld [vmem:[%s3882_s8 + $0xf0] sm:$0xff] }
  0x32   : > { %2332 = vmatprep.subr.mxu0 %v2885_v2  ;;  %2365 = vmatprep.subr.mxu1 %v2885_v2  ;;  %v1031_v7 = vld [vmem:[%s3882_s8 + $0xf8] sm:$0xff]  ;;  %v1026_v9 = vld [vmem:[%s3882_s8 + $0xd0] sm:$0xff]  ;;  %v1025_v10 = vld [vmem:[%s3882_s8 + $0xc8] sm:$0xff] }
  0x33   : > { %2333 = vmatpush3.msra.mxu0 %v669_v22  ;;  %2366 = vmatpush3.msra.mxu1 %v756_v25  ;;  %v1021_v11 = vld [vmem:[%s3882_s8 + $0xa8] sm:$0xff]  ;;  %v1020_v12 = vld [vmem:[%s3882_s8 + $0xa0] sm:$0xff]  ;;  %v1015_v14 = vld [vmem:[%s3882_s8 + $0x78] sm:$0xff] }
  0x34   : > { %2334 = vmatprep.subr.mxu0 %v2885_v2  ;;  %2367 = vmatprep.subr.mxu1 %v2885_v2  ;;  %v1016_v13 = vld [vmem:[%s3882_s8 + $0x80] sm:$0xff]  ;;  %v1011_v15 = vld [vmem:[%s3882_s8 + $0x58] sm:$0xff]  ;;  %v1010_v16 = vld [vmem:[%s3882_s8 + $0x50] sm:$0xff] }
  0x35   : > { %2335 = vmatpush3.msra.mxu0 %v668_v24  ;;  %2368 = vmatpush3.msra.mxu1 %v755_v27  ;;  %v1006_v17 = vld [vmem:[%s3882_s8 + $0x30] sm:$0xff]  ;;  %v1005_v18 = vld [vmem:[%s3882_s8 + $0x28] sm:$0xff]  ;;  %v1000_v20 = vld [vmem:[%s3882_s8] sm:$0xff]  ;;  %v2887_v27 = vmov 0  }
  0x36   : > { %2336 = vmatprep.subr.mxu0 %v2885_v2  ;;  %2369 = vmatprep.subr.mxu1 %v2885_v2  ;;  %v1001_v19 = vld [vmem:[%s3882_s8 + $0x8] sm:$0xff]  ;;  %v3331_v21 = vld [vmem:[%s602_s14] sm:$0xff]  ;;  %v1078_v22 = vld [vmem:[%s3882_s8 + $0x270] sm:$0xff]  ;;  %s1866_s14 = sshll.u32 %s3754_s17, 4  ;;  %s1867_s14 = int_to_ptr.vmem [resolvable:$true] %s1866_s14 }
  0x37   : > { %2337 = vmatpush3.msra.mxu0 %v667_v26  ;;  %2370 = vmatpush3.msra.mxu1 %v754_v29  ;;  %v1079_v23 = vld [vmem:[%s3882_s8 + $0x278] sm:$0xff]  ;;  %v1074_v24 = vld [vmem:[%s3882_s8 + $0x250] sm:$0xff]  ;;  %v1069_v25 = vld [vmem:[%s3882_s8 + $0x228] sm:$0xff]  ;;  %p2784_p1 = scmp.lt.s32.totalorder %s1867_s14, %s2782_s0 }
  0x38   : > { %2338 = vmatprep.subr.mxu0 %v2885_v2  ;;  %2371 = vmatprep.subr.mxu1 %v2885_v2  ;;  %v838_v26 = vld [vmem:[#allocation2] sm:$0x1]  ;;  %v1059_v29 = vld [vmem:[%s3882_s8 + $0x1d8] sm:$0xff] }
  0x39   : > { %2339 = vmatpush3.msra.mxu0 %v666_v28  ;;  %2372 = vmatpush3.msra.mxu1 %v753_v31  ;;  %v1064_v28 = vld [vmem:[%s3882_s8 + $0x200] sm:$0xff]  ;;  %v1049_v31 = vld [vmem:[%s3882_s8 + $0x188] sm:$0xff] }
  0x3a   : > { %2340 = vmatprep.subr.mxu0 %v2885_v2  ;;  %2373 = vmatprep.subr.mxu1 %v2885_v2 }
  0x3b   : > { %2341 = vmatpush3.msra.mxu0 %v665_v30  ;;  %2374 = vmatpush3.msra.mxu1 %v752_v33  ;;  %v1054_v30 = vld [vmem:[%s3882_s8 + $0x1b0] sm:$0xff]  ;;  %v1039_v33 = vld [vmem:[%s3882_s8 + $0x138] sm:$0xff] }
  0x3c   : > { %2343 = vmatmul.mubr.f32.vlgmr.msra.gmra.mxu0 %v648_v32  ;;  %2380 = vmatprep.subr.mxu0 %v2885_v2 }
  0x3d   : > { %2375 = vmatprep.subr.mxu1 %v2885_v2  ;;  %2381 = vmatpush3.msra.mxu0 %v664_v34 }
  0x3e   : > { %2376 = vmatpush3.msra.mxu1 %v751_v35  ;;  %2382 = vmatprep.subr.mxu0 %v2885_v2  ;;  %v1029_v35 = vld [vmem:[%s3882_s8 + $0xe8] sm:$0xff] }
  0x3f   : > { %2378 = vmatmul.mubr.f32.vlgmr.msra.gmra.mxu1 %v648_v32  ;;  %2383 = vmatpush3.msra.mxu0 %v663_v36  ;;  %v1044_v32 = vld [vmem:[%s3882_s8 + $0x160] sm:$0xff] }
  0x40   : > { %2384 = vmatprep.subr.mxu0 %v2885_v2  ;;  %2412 = vmatprep.mubr.msk.f32.mxu0 %vm2886_vm0, %v2885_v2 }
  0x41   : > { %2385 = vmatpush3.msra.mxu0 %v662_v37  ;;  %2415 = vmatprep.subr.mxu1 %v2885_v2 }
  0x42   : > { %2386 = vmatprep.subr.mxu0 %v2885_v2  ;;  %2416 = vmatpush3.msra.mxu1 %v664_v34  ;;  %v1034_v34 = vld [vmem:[%s3882_s8 + $0x110] sm:$0xff] }
  0x43   : > { %2387 = vmatpush3.msra.mxu0 %v661_v38  ;;  %2417 = vmatprep.subr.mxu1 %v2885_v2 }
  0x44   : > { %2388 = vmatprep.subr.mxu0 %v2885_v2  ;;  %2418 = vmatpush3.msra.mxu1 %v663_v36  ;;  %v1024_v36 = vld [vmem:[%s3882_s8 + $0xc0] sm:$0xff] }
  0x45   : > { %2389 = vmatpush3.msra.mxu0 %v660_v39  ;;  %2419 = vmatprep.subr.mxu1 %v2885_v2 }
  0x46   : > { %2390 = vmatprep.subr.mxu0 %v2885_v2  ;;  %2420 = vmatpush3.msra.mxu1 %v662_v37  ;;  %v1019_v37 = vld [vmem:[%s3882_s8 + $0x98] sm:$0xff] }
  0x47   : > { %2391 = vmatpush3.msra.mxu0 %v659_v40  ;;  %2421 = vmatprep.subr.mxu1 %v2885_v2 }
  0x48   : > { %2392 = vmatprep.subr.mxu0 %v2885_v2  ;;  %2422 = vmatpush3.msra.mxu1 %v661_v38  ;;  %v1014_v38 = vld [vmem:[%s3882_s8 + $0x70] sm:$0xff] }
  0x49   : > { %2393 = vmatpush3.msra.mxu0 %v658_v41  ;;  %2423 = vmatprep.subr.mxu1 %v2885_v2 }
  0x4a   : > { %2394 = vmatprep.subr.mxu0 %v2885_v2  ;;  %2424 = vmatpush3.msra.mxu1 %v660_v39  ;;  %v1009_v39 = vld [vmem:[%s3882_s8 + $0x48] sm:$0xff] }
  0x4b   : > { %2395 = vmatpush3.msra.mxu0 %v657_v42  ;;  %2425 = vmatprep.subr.mxu1 %v2885_v2 }
  0x4c   : > { %2396 = vmatprep.subr.mxu0 %v2885_v2  ;;  %2426 = vmatpush3.msra.mxu1 %v659_v40  ;;  %v1004_v40 = vld [vmem:[%s3882_s8 + $0x20] sm:$0xff] }
  0x4d   : > { %2397 = vmatpush3.msra.mxu0 %v656_v43  ;;  %2427 = vmatprep.subr.mxu1 %v2885_v2 }
  0x4e   : > { %2398 = vmatprep.subr.mxu0 %v2885_v2  ;;  %2428 = vmatpush3.msra.mxu1 %v658_v41  ;;  %v3412_v41 = vld [vmem:[%s3407_s26 + $0x78] sm:$0xff] }
  0x4f   : > { %2399 = vmatpush3.msra.mxu0 %v655_v44  ;;  %2429 = vmatprep.subr.mxu1 %v2885_v2 }
  0x50   : > { %2400 = vmatprep.subr.mxu0 %v2885_v2  ;;  %2430 = vmatpush3.msra.mxu1 %v657_v42  ;;  %v3419_v42 = vld [vmem:[%s3407_s26 + $0x70] sm:$0xff] }
  0x51   : > { %2401 = vmatpush3.msra.mxu0 %v654_v45  ;;  %2431 = vmatprep.subr.mxu1 %v2885_v2 }
  0x52   : > { %2402 = vmatprep.subr.mxu0 %v2885_v2  ;;  %2432 = vmatpush3.msra.mxu1 %v656_v43  ;;  %v3424_v43 = vld [vmem:[%s3407_s26 + $0x68] sm:$0xff] }
  0x53   : > { %2403 = vmatpush3.msra.mxu0 %v653_v46  ;;  %2433 = vmatprep.subr.mxu1 %v2885_v2 }
  0x54   : > { %2404 = vmatprep.subr.mxu0 %v2885_v2  ;;  %2434 = vmatpush3.msra.mxu1 %v655_v44  ;;  %v3429_v44 = vld [vmem:[%s3407_s26 + $0x60] sm:$0xff] }
  0x55   : > { %2405 = vmatpush3.msra.mxu0 %v652_v47  ;;  %2435 = vmatprep.subr.mxu1 %v2885_v2 }
  0x56   : > { %2406 = vmatprep.subr.mxu0 %v2885_v2  ;;  %2436 = vmatpush3.msra.mxu1 %v654_v45  ;;  %v3434_v45 = vld [vmem:[%s3407_s26 + $0x58] sm:$0xff] }
  0x57   : > { %2407 = vmatpush3.msra.mxu0 %v651_v48  ;;  %2437 = vmatprep.subr.mxu1 %v2885_v2 }
  0x58   : > { %2408 = vmatprep.subr.mxu0 %v2885_v2  ;;  %2438 = vmatpush3.msra.mxu1 %v653_v46  ;;  %v3439_v46 = vld [vmem:[%s3407_s26 + $0x50] sm:$0xff] }
  0x59   : > { %2409 = vmatpush3.msra.mxu0 %v650_v49  ;;  %2439 = vmatprep.subr.mxu1 %v2885_v2 }
  0x5a   : > { %2410 = vmatprep.subr.mxu0 %v2885_v2  ;;  %2440 = vmatpush3.msra.mxu1 %v652_v47  ;;  %v3444_v47 = vld [vmem:[%s3407_s26 + $0x48] sm:$0xff] }
  0x5b   : > { %2411 = vmatpush3.msra.mxu0 %v649_v50  ;;  %2441 = vmatprep.subr.mxu1 %v2885_v2 }
  0x5c   : > { %1080 = vmatprep.subr.mxu0 %v1076_v51  ;;  %2413 = vmatmul.mubr.f32.vlgmr.msra.gmra.mxu0 %v837_v52  ;;  %v3464_v51 = vld [vmem:[%s3407_s26 + $0x28] sm:$0xff]  ;;  %v3469_v52 = vld [vmem:[%s3407_s26 + $0x20] sm:$0xff] }
  0x5d   : > { %1081 = vmatpush1.msra.mxu0 %v1075_v53  ;;  %2442 = vmatpush3.msra.mxu1 %v651_v48  ;;  %v3449_v48 = vld [vmem:[%s3407_s26 + $0x40] sm:$0xff]  ;;  %v3474_v53 = vld [vmem:[%s3407_s26 + $0x18] sm:$0xff] }
  0x5e   : > { %1082 = vmatprep.subr.mxu0 %v1071_v54  ;;  %1144 = vmatprep.mubr.f32.mxu0 %v2885_v2  ;;  %v3479_v54 = vld [vmem:[%s3407_s26 + $0x10] sm:$0xff] }
  0x5f   : > { %1083 = vmatpush1.msra.mxu0 %v1070_v55  ;;  %2443 = vmatprep.subr.mxu1 %v2885_v2  ;;  %v3484_v55 = vld [vmem:[%s3407_s26 + $0x8] sm:$0xff] }
  0x60   : > { %1084 = vmatprep.subr.mxu0 %v1066_v56  ;;  %2444 = vmatpush3.msra.mxu1 %v650_v49  ;;  %v3454_v49 = vld [vmem:[%s3407_s26 + $0x38] sm:$0xff]  ;;  %v3489_v56 = vld [vmem:[%s3407_s26] sm:$0xff] }
  0x61   : > { %1085 = vmatpush1.msra.mxu0 %v1065_v57  ;;  %2445 = vmatprep.subr.mxu1 %v2885_v2  ;;  %v1077_v57 = vld [vmem:[%s3882_s8 + $0x268] sm:$0xff] }
  0x62   : > { %1086 = vmatprep.subr.mxu0 %v1061_v58  ;;  %2446 = vmatpush3.msra.mxu1 %v649_v50  ;;  %v3459_v50 = vld [vmem:[%s3407_s26 + $0x30] sm:$0xff]  ;;  %s2777_s26 = scalar_lea.vmem %s1867_s14, 128 }
  0x63   : > { %1087 = vmatpush1.msra.mxu0 %v1060_v59  ;;  %2447 = vmatprep.mubr.msk.f32.mxu1 %vm2886_vm0, %v2885_v2  ;;  %v1073_v59 = vld [vmem:[%s3882_s8 + $0x248] sm:$0xff]  ;;  %p2778_p12 = scmp.ne.s32.totalorder %s1867_s14, %s2777_s26  ;;  %p2785_p2 = scmp.lt.s32.totalorder %s2783_s25, %s2777_s26 }
  0x64   : > { %1088 = vmatprep.subr.mxu0 %v1056_v60  ;;  %1151 = vmatprep.subr.mxu1 %v1078_v22  ;;  %v1072_v60 = vld [vmem:[%s3882_s8 + $0x240] sm:$0xff]  ;;  %v1018_v22 = vld [vmem:[%s3882_s8 + $0x90] sm:$0xff] }
  0x65   : > { %1089 = vmatpush1.msra.mxu0 %v1055_v61  ;;  %2771 = vset.pattern.permute.xlu0 %v2887_v27  ;;  %p2779_p13 = pnand %p2778_p12, %p3009_p4  ;;  %p2786_p3 = por %p2785_p2, %p2784_p1 }
  0x66   : > { %1090 = vmatprep.subr.mxu0 %v1051_v62  ;;  %841 = vperm.xlu0 %2771, %v838_v26   ;;  %v1068_v62 = vld [vmem:[%s3882_s8 + $0x220] sm:$0xff] }
  0x67   : > { %1091 = vmatpush1.msra.mxu0 %v1050_v63  ;;  %2772 = vset.pattern.permute.xlu1 %v2887_v27  ;;  %v1067_v63 = vld [vmem:[%s3882_s8 + $0x218] sm:$0xff]  ;;  %v1008_v26 = vld [vmem:[%s3882_s8 + $0x40] sm:$0xff]  ;;  %p2780_p0 = pneg %p2779_p13 }
  0x68   : > { %1092 = vmatprep.subr.mxu0 %v1046_v0  ;;  %v1063_v0 = vld [vmem:[%s3882_s8 + $0x1f8] sm:$0xff] }
  0x69   : > { %1093 = vmatpush1.msra.mxu0 %v1045_v1  ;;  %v1007_v27 = vld [vmem:[%s3882_s8 + $0x38] sm:$0xff]  ;;  %p2787_p5 = pnand %p2786_p3, %p2780_p0 }
  0x6a   : > { %1094 = vmatprep.subr.mxu0 %v1041_v3  ;;  %v1062_v3 = vld [vmem:[%s3882_s8 + $0x1f0] sm:$0xff] }
  0x6b   : > { %1095 = vmatpush1.msra.mxu0 %v1040_v4  ;;  %v1058_v4 = vld [vmem:[%s3882_s8 + $0x1d0] sm:$0xff] }
  0x6c   : > { %1096 = vmatprep.subr.mxu0 %v1036_v5 }
  0x6d   : > { %1097 = vmatpush1.msra.mxu0 %v1035_v6  ;;  %v1057_v6 = vld [vmem:[%s3882_s8 + $0x1c8] sm:$0xff] }
  0x6e   : > { %1098 = vmatprep.subr.mxu0 %v1031_v7  ;;  %v1053_v7 = vld [vmem:[%s3882_s8 + $0x1a8] sm:$0xff] }
  0x6f   : > { %1099 = vmatpush1.msra.mxu0 %v1030_v8  ;;  %v1052_v8 = vld [vmem:[%s3882_s8 + $0x1a0] sm:$0xff] }
  0x70   : > { %1100 = vmatprep.subr.mxu0 %v1026_v9  ;;  %v1048_v9 = vld [vmem:[%s3882_s8 + $0x180] sm:$0xff] }
  0x71   : > { %1101 = vmatpush1.msra.mxu0 %v1025_v10  ;;  %v1047_v10 = vld [vmem:[%s3882_s8 + $0x178] sm:$0xff] }
  0x72   : > { %1102 = vmatprep.subr.mxu0 %v1021_v11  ;;  %v1043_v11 = vld [vmem:[%s3882_s8 + $0x158] sm:$0xff] }
  0x73   : > { %1103 = vmatpush1.msra.mxu0 %v1020_v12  ;;  %v1042_v12 = vld [vmem:[%s3882_s8 + $0x150] sm:$0xff] }
  0x74   : > { %1104 = vmatprep.subr.mxu0 %v1016_v13  ;;  %v1038_v13 = vld [vmem:[%s3882_s8 + $0x130] sm:$0xff] }
  0x75   : > { %1105 = vmatpush1.msra.mxu0 %v1015_v14  ;;  %v1037_v14 = vld [vmem:[%s3882_s8 + $0x128] sm:$0xff] }
  0x76   : > { %1106 = vmatprep.subr.mxu0 %v1011_v15  ;;  %v1033_v15 = vld [vmem:[%s3882_s8 + $0x108] sm:$0xff] }
  0x77   : > { %1107 = vmatpush1.msra.mxu0 %v1010_v16  ;;  %v1032_v16 = vld [vmem:[%s3882_s8 + $0x100] sm:$0xff] }
  0x78   : > { %1108 = vmatprep.subr.mxu0 %v1006_v17  ;;  %v1028_v17 = vld [vmem:[%s3882_s8 + $0xe0] sm:$0xff] }
  0x79   : > { %1109 = vmatpush1.msra.mxu0 %v1005_v18  ;;  %v1027_v18 = vld [vmem:[%s3882_s8 + $0xd8] sm:$0xff] }
  0x7a   : > { %1110 = vmatprep.subr.mxu0 %v1001_v19  ;;  %v1023_v19 = vld [vmem:[%s3882_s8 + $0xb8] sm:$0xff] }
  0x7b   : > { %1111 = vmatpush1.msra.mxu0 %v1000_v20  ;;  %v1022_v20 = vld [vmem:[%s3882_s8 + $0xb0] sm:$0xff] }
  0x7c   : > { %1145 = vmatmul.mubr.f32.vlgmr.msra.gmra.mxu0 %v3331_v21  ;;  %2450 = vmatprep.subr.mxu0 %v2885_v2 }
  0x7d   : > { %2482 = vmatprep.mubr.msk.f32.mxu0 %vm2886_vm0, %v2885_v2  ;;  %2451 = vmatpush3.msra.mxu0 %v1079_v23  ;;  %v1017_v23 = vld [vmem:[%s3882_s8 + $0x88] sm:$0xff] }
  0x7e   : > { %2452 = vmatprep.subr.mxu0 %v2885_v2 }
  0x7f   : > { %2453 = vmatpush3.msra.mxu0 %v1074_v24  ;;  %v1013_v24 = vld [vmem:[%s3882_s8 + $0x68] sm:$0xff] }
  0x80   : > { %2454 = vmatprep.subr.mxu0 %v2885_v2 }
  0x81   : > { %2455 = vmatpush3.msra.mxu0 %v1069_v25  ;;  %v1012_v25 = vld [vmem:[%s3882_s8 + $0x60] sm:$0xff] }
  0x82   : > { %2456 = vmatprep.subr.mxu0 %v2885_v2 }
  0x83   : > { %2457 = vmatpush3.msra.mxu0 %v1064_v28  ;;  %v1003_v28 = vld [vmem:[%s3882_s8 + $0x18] sm:$0xff] }
  0x84   : > { %2458 = vmatprep.subr.mxu0 %v2885_v2 }
  0x85   : > { %2459 = vmatpush3.msra.mxu0 %v1059_v29  ;;  %v1002_v29 = vld [vmem:[%s3882_s8 + $0x10] sm:$0xff] }
  0x86   : > { %2460 = vmatprep.subr.mxu0 %v2885_v2 }
  0x87   : > { %2461 = vmatpush3.msra.mxu0 %v1054_v30  ;;  %v1292_v30 = vld [vmem:[%s3883_s9] sm:$0x1f] }
  0x88   : > { %2462 = vmatprep.subr.mxu0 %v2885_v2 }
  0x89   : > { %2463 = vmatpush3.msra.mxu0 %v1049_v31 }
  0x8a   : > { %2464 = vmatprep.subr.mxu0 %v2885_v2 }
  0x8b   : > { %2465 = vmatpush3.msra.mxu0 %v1044_v32 }
  0x8c   : > { %2466 = vmatprep.subr.mxu0 %v2885_v2 }
  0x8d   : > { %2467 = vmatpush3.msra.mxu0 %v1039_v33  ;;  %v1363_v33 = vld [vmem:[%s3884_s10] sm:$0x1f] }
  0x8e   : > { %2468 = vmatprep.subr.mxu0 %v2885_v2 }
  0x8f   : > { %2469 = vmatpush3.msra.mxu0 %v1034_v34 }
  0x90   : > { %2470 = vmatprep.subr.mxu0 %v2885_v2 }
  0x91   : > { %2471 = vmatpush3.msra.mxu0 %v1029_v35 }
  0x92   : > { %2472 = vmatprep.subr.mxu0 %v2885_v2 }
  0x93   : > { %2473 = vmatpush3.msra.mxu0 %v1024_v36 }
  0x94   : > { %2474 = vmatprep.subr.mxu0 %v2885_v2 }
  0x95   : > { %2475 = vmatpush3.msra.mxu0 %v1019_v37  ;;  %v1364_v37 = vld [vmem:[%s3885_s11] sm:$0x1f] }
  0x96   : > { %2476 = vmatprep.subr.mxu0 %v2885_v2  ;;  %1367 = vperm.xlu0 %2771, %v1364_v37  }
  0x97   : > { %2477 = vmatpush3.msra.mxu0 %v1014_v38  ;;  %v2888_v38 = vmov 1  }
  0x98   : > { %2478 = vmatprep.subr.mxu0 %v2885_v2 }
  0x99   : > { %2479 = vmatpush3.msra.mxu0 %v1009_v39  ;;  %v844_v39 = vlaneseq }
  0x9a   : > { %2480 = vmatprep.subr.mxu0 %v2885_v2  ;;  %2773 = vset.pattern.permute.xlu0 %v2888_v38 }
  0x9b   : > { %2481 = vmatpush3.msra.mxu0 %v1004_v40  ;;  %v3742_v40 = vshrl.u32 %v844_v39, 7 }
  0x9c   : > { %2483 = vmatmul.mubr.f32.vlgmr.msra.gmra.mxu0 %v3331_v21  ;;  %2525 = vmatprep.subr.mxu0 %v2885_v2 }
  0x9d   : > { %2526 = vmatpush3.msra.mxu0 %v3412_v41  ;;  %2557 = vmatprep.mubr.msk.f32.mxu0 %vm2886_vm0, %v2885_v2 }
  0x9e   : > { %2527 = vmatprep.subr.mxu0 %v2885_v2 }
  0x9f   : > { %2528 = vmatpush3.msra.mxu0 %v3419_v42 }
  0xa0   : > { %2529 = vmatprep.subr.mxu0 %v2885_v2 }
  0xa1   : > { %2530 = vmatpush3.msra.mxu0 %v3424_v43 }
  0xa2   : > { %2531 = vmatprep.subr.mxu0 %v2885_v2 }
  0xa3   : > { %2532 = vmatpush3.msra.mxu0 %v3429_v44 }
  0xa4   : > { %2533 = vmatprep.subr.mxu0 %v2885_v2 }
  0xa5   : > { %2534 = vmatpush3.msra.mxu0 %v3434_v45 }
  0xa6   : > { %2535 = vmatprep.subr.mxu0 %v2885_v2 }
  0xa7   : > { %2536 = vmatpush3.msra.mxu0 %v3439_v46 }
  0xa8   : > { %2537 = vmatprep.subr.mxu0 %v2885_v2 }
  0xa9   : > { %2538 = vmatpush3.msra.mxu0 %v3444_v47 }
  0xaa   : > { %2539 = vmatprep.subr.mxu0 %v2885_v2 }
  0xab   : > { %2540 = vmatpush3.msra.mxu0 %v3449_v48 }
  0xac   : > { %2541 = vmatprep.subr.mxu0 %v2885_v2 }
  0xad   : > { %2542 = vmatpush3.msra.mxu0 %v3454_v49 }
  0xae   : > { %2543 = vmatprep.subr.mxu0 %v2885_v2 }
  0xaf   : > { %2544 = vmatpush3.msra.mxu0 %v3459_v50 }
  0xb0   : > { %2545 = vmatprep.subr.mxu0 %v2885_v2 }
  0xb1   : > { %2546 = vmatpush3.msra.mxu0 %v3464_v51 }
  0xb2   : > { %2547 = vmatprep.subr.mxu0 %v2885_v2 }
  0xb3   : > { %2548 = vmatpush3.msra.mxu0 %v3469_v52 }
  0xb4   : > { %2549 = vmatprep.subr.mxu0 %v2885_v2 }
  0xb5   : > { %2550 = vmatpush3.msra.mxu0 %v3474_v53 }
  0xb6   : > { %2551 = vmatprep.subr.mxu0 %v2885_v2 }
  0xb7   : > { %2552 = vmatpush3.msra.mxu0 %v3479_v54 }
  0xb8   : > { %2553 = vmatprep.subr.mxu0 %v2885_v2 }
  0xb9   : > { %2554 = vmatpush3.msra.mxu0 %v3484_v55 }
  0xba   : > { %2555 = vmatprep.subr.mxu0 %v2885_v2 }
  0xbb   : > { %2556 = vmatpush3.msra.mxu0 %v3489_v56 }
  0xbc   : > { %2595 = vmatprep.subr.mxu0 %v2885_v2 }
  0xfc   : > { %v747_v58 = vpop.f32.mrf.mxu0 }
  0xfd   : > { %2448 = vmatmul.mubr.f32.vlgmr.msra.gmra.mxu1 %v747_v58  ;;  %v842_v58 = vpop.permute.xlu0 %841 }
  0xfe   : > { %1152 = vmatpush1.msra.mxu1 %v1077_v57  ;;  %v2344_v61 = vpop.f32.mrf.mxu0  ;;  %1215 = vmatprep.mubr.f32.mxu1 %v2885_v2  ;;  %v3745_v57 = vsub.s32 0, %v3742_v40 }
  0xff   : > { %1153 = vmatprep.subr.mxu1 %v1073_v59  ;;  %v833_v1 = vpop.f32.mrf.mxu1 }
 0x100   : > { %1154 = vmatpush1.msra.mxu1 %v1072_v60  ;;  %920 = vperm.xlu1 %2772, %v833_v1   ;;  %v847_v59 = vrot.slane %v842_v58, %v3745_v57 }
 0x101   : > { %1155 = vmatprep.subr.mxu1 %v1068_v62  ;;  %v2379_v5 = vpop.f32.mrf.mxu1 }
 0x102   : > { %1156 = vmatpush1.msra.mxu1 %v1067_v63 }
 0x103   : > { %1157 = vmatprep.subr.mxu1 %v1063_v0 }
 0x104   : > { %1158 = vmatpush1.msra.mxu1 %v1062_v3 }
 0x105   : > { %1159 = vmatprep.subr.mxu1 %v1058_v4 }
 0x106   : > { %1160 = vmatpush1.msra.mxu1 %v1057_v6 }
 0x107   : > { %1161 = vmatprep.subr.mxu1 %v1053_v7 }
 0x108   : > { %1162 = vmatpush1.msra.mxu1 %v1052_v8  ;;  %v2890_v8 = vmov 2  }
 0x109   : > { %1163 = vmatprep.subr.mxu1 %v1048_v9 }
 0x10a   : > { %1164 = vmatpush1.msra.mxu1 %v1047_v10 }
 0x10b   : > { %1165 = vmatprep.subr.mxu1 %v1043_v11 }
 0x10c   : > { %1166 = vmatpush1.msra.mxu1 %v1042_v12 }
 0x10d   : > { %1167 = vmatprep.subr.mxu1 %v1038_v13 }
 0x10e   : > { %1168 = vmatpush1.msra.mxu1 %v1037_v14 }
 0x10f   : > { %1169 = vmatprep.subr.mxu1 %v1033_v15 }
 0x110   : > { %1170 = vmatpush1.msra.mxu1 %v1032_v16 }
 0x111   : > { %1171 = vmatprep.subr.mxu1 %v1028_v17 }
 0x112   : > { %1172 = vmatpush1.msra.mxu1 %v1027_v18 }
 0x113   : > { %1173 = vmatprep.subr.mxu1 %v1023_v19 }
 0x114   : > { %1174 = vmatpush1.msra.mxu1 %v1022_v20 }
 0x115   : > { %1175 = vmatprep.subr.mxu1 %v1018_v22 }
 0x116   : > { %1176 = vmatpush1.msra.mxu1 %v1017_v23 }
 0x117   : > { %1177 = vmatprep.subr.mxu1 %v1013_v24 }
 0x118   : > { %1178 = vmatpush1.msra.mxu1 %v1012_v25 }
 0x119   : > { %1179 = vmatprep.subr.mxu1 %v1008_v26 }
 0x11a   : > { %1180 = vmatpush1.msra.mxu1 %v1007_v27 }
 0x11b   : > { %1181 = vmatprep.subr.mxu1 %v1003_v28 }
 0x11c   : > { %1182 = vmatpush1.msra.mxu1 %v1002_v29  ;;  %v3593_v31 = vpop.f32.mrf.mxu0 }
 0x11d   : > { %1216 = vmatmul.mubr.f32.vlgmr.msra.gmra.mxu1 %v3331_v21  ;;  %2485 = vmatprep.subr.mxu1 %v2885_v2  ;;  %v915_v60 = vadd.f32 %v3593_v31, %v847_v59 }
 0x11e   : > { %2486 = vmatpush3.xpose.msra.mxu1 %v1292_v30  ;;  %2487 = vmatprep.mubr.msk.f32.mxu1 %vm2886_vm0, %v2885_v2  ;;  %v2414_v32 = vpop.f32.mrf.mxu0 }
 0x11f   : > { %2490 = vmatprep.subr.mxu1 %v2885_v2  ;;  %v996_v63 = vrot.slane %v915_v60, %v3745_v57 }
 0x121   : > { %2488 = vmatmul.mubr.f32.vlgmr.msra.gmra.mxu1 %v3331_v21 }
 0x122   : > { %2491 = vmatpush3.msra.mxu1 %v3412_v41  ;;  %2522 = vmatprep.mubr.msk.f32.mxu1 %vm2886_vm0, %v2885_v2 }
 0x123   : > { %2492 = vmatprep.subr.mxu1 %v2885_v2 }
 0x124   : > { %2493 = vmatpush3.msra.mxu1 %v3419_v42 }
 0x125   : > { %2494 = vmatprep.subr.mxu1 %v2885_v2 }
 0x126   : > { %2495 = vmatpush3.msra.mxu1 %v3424_v43 }
 0x127   : > { %2496 = vmatprep.subr.mxu1 %v2885_v2 }
 0x128   : > { %2497 = vmatpush3.msra.mxu1 %v3429_v44 }
 0x129   : > { %2498 = vmatprep.subr.mxu1 %v2885_v2 }
 0x12a   : > { %2499 = vmatpush3.msra.mxu1 %v3434_v45 }
 0x12b   : > { %2500 = vmatprep.subr.mxu1 %v2885_v2 }
 0x12c   : > { %2501 = vmatpush3.msra.mxu1 %v3439_v46 }
 0x12d   : > { %2502 = vmatprep.subr.mxu1 %v2885_v2 }
 0x12e   : > { %2503 = vmatpush3.msra.mxu1 %v3444_v47 }
 0x12f   : > { %2504 = vmatprep.subr.mxu1 %v2885_v2 }
 0x130   : > { %2505 = vmatpush3.msra.mxu1 %v3449_v48 }
 0x131   : > { %2506 = vmatprep.subr.mxu1 %v2885_v2 }
 0x132   : > { %2507 = vmatpush3.msra.mxu1 %v3454_v49 }
 0x133   : > { %2508 = vmatprep.subr.mxu1 %v2885_v2 }
 0x134   : > { %2509 = vmatpush3.msra.mxu1 %v3459_v50 }
 0x135   : > { %2510 = vmatprep.subr.mxu1 %v2885_v2 }
 0x136   : > { %2511 = vmatpush3.msra.mxu1 %v3464_v51 }
 0x137   : > { %2512 = vmatprep.subr.mxu1 %v2885_v2 }
 0x138   : > { %2513 = vmatpush3.msra.mxu1 %v3469_v52 }
 0x139   : > { %2514 = vmatprep.subr.mxu1 %v2885_v2 }
 0x13a   : > { %2515 = vmatpush3.msra.mxu1 %v3474_v53 }
 0x13b   : > { %2516 = vmatprep.subr.mxu1 %v2885_v2 }
 0x13c   : > { %2517 = vmatpush3.msra.mxu1 %v3479_v54  ;;  %v1146_v21 = vpop.f32.mrf.mxu0 }
 0x13d   : > { %2518 = vmatprep.subr.mxu1 %v2885_v2  ;;  %2558 = vmatmul.mubr.f32.vlgmr.msra.gmra.mxu0 %v1146_v21 }
 0x13e   : > { %2519 = vmatpush3.msra.mxu1 %v3484_v55  ;;  %2596 = vmatpush3.msra.mxu0 %v3412_v41  ;;  %v1148_v34 = vpop.f32.mrf.mxu0 }
 0x13f   : > { %2520 = vmatprep.subr.mxu1 %v2885_v2  ;;  %2597 = vmatprep.subr.mxu0 %v2885_v2 }
 0x140   : > { %2521 = vmatpush3.msra.mxu1 %v3489_v56  ;;  %2598 = vmatpush3.msra.mxu0 %v3419_v42 }
 0x141   : > { %2560 = vmatprep.subr.mxu1 %v2885_v2  ;;  %2523 = vmatmul.mubr.f32.vlgmr.msra.gmra.mxu1 %v1363_v33 }
 0x142   : > { %2561 = vmatpush3.msra.mxu1 %v3412_v41  ;;  %2592 = vmatprep.mubr.msk.f32.mxu1 %vm2886_vm0, %v2885_v2 }
 0x143   : > { %2562 = vmatprep.subr.mxu1 %v2885_v2  ;;  %2599 = vmatprep.subr.mxu0 %v2885_v2 }
 0x144   : > { %2563 = vmatpush3.msra.mxu1 %v3419_v42  ;;  %2600 = vmatpush3.msra.mxu0 %v3424_v43 }
 0x145   : > { %2564 = vmatprep.subr.mxu1 %v2885_v2  ;;  %2601 = vmatprep.subr.mxu0 %v2885_v2 }
 0x146   : > { %2565 = vmatpush3.msra.mxu1 %v3424_v43  ;;  %2602 = vmatpush3.msra.mxu0 %v3429_v44 }
 0x147   : > { %2566 = vmatprep.subr.mxu1 %v2885_v2  ;;  %2603 = vmatprep.subr.mxu0 %v2885_v2 }
 0x148   : > { %2567 = vmatpush3.msra.mxu1 %v3429_v44  ;;  %2604 = vmatpush3.msra.mxu0 %v3434_v45 }
 0x149   : > { %2568 = vmatprep.subr.mxu1 %v2885_v2  ;;  %2605 = vmatprep.subr.mxu0 %v2885_v2 }
 0x14a   : > { %2569 = vmatpush3.msra.mxu1 %v3434_v45  ;;  %2606 = vmatpush3.msra.mxu0 %v3439_v46 }
 0x14b   : > { %2570 = vmatprep.subr.mxu1 %v2885_v2  ;;  %2607 = vmatprep.subr.mxu0 %v2885_v2 }
 0x14c   : > { %2571 = vmatpush3.msra.mxu1 %v3439_v46  ;;  %2608 = vmatpush3.msra.mxu0 %v3444_v47 }
 0x14d   : > { %2572 = vmatprep.subr.mxu1 %v2885_v2  ;;  %2609 = vmatprep.subr.mxu0 %v2885_v2 }
 0x14e   : > { %2573 = vmatpush3.msra.mxu1 %v3444_v47  ;;  %2610 = vmatpush3.msra.mxu0 %v3449_v48 }
 0x14f   : > { %2574 = vmatprep.subr.mxu1 %v2885_v2  ;;  %2611 = vmatprep.subr.mxu0 %v2885_v2 }
 0x150   : > { %2575 = vmatpush3.msra.mxu1 %v3449_v48  ;;  %2612 = vmatpush3.msra.mxu0 %v3454_v49 }
 0x151   : > { %2576 = vmatprep.subr.mxu1 %v2885_v2  ;;  %2613 = vmatprep.subr.mxu0 %v2885_v2 }
 0x152   : > { %2577 = vmatpush3.msra.mxu1 %v3454_v49  ;;  %2614 = vmatpush3.msra.mxu0 %v3459_v50 }
 0x153   : > { %2578 = vmatprep.subr.mxu1 %v2885_v2  ;;  %2615 = vmatprep.subr.mxu0 %v2885_v2 }
 0x154   : > { %2579 = vmatpush3.msra.mxu1 %v3459_v50  ;;  %2616 = vmatpush3.msra.mxu0 %v3464_v51 }
 0x155   : > { %2580 = vmatprep.subr.mxu1 %v2885_v2  ;;  %2617 = vmatprep.subr.mxu0 %v2885_v2 }
 0x156   : > { %2581 = vmatpush3.msra.mxu1 %v3464_v51  ;;  %2618 = vmatpush3.msra.mxu0 %v3469_v52 }
 0x157   : > { %2582 = vmatprep.subr.mxu1 %v2885_v2  ;;  %2619 = vmatprep.subr.mxu0 %v2885_v2 }
 0x158   : > { %2583 = vmatpush3.msra.mxu1 %v3469_v52  ;;  %2620 = vmatpush3.msra.mxu0 %v3474_v53 }
 0x159   : > { %2584 = vmatprep.subr.mxu1 %v2885_v2  ;;  %2621 = vmatprep.subr.mxu0 %v2885_v2 }
 0x15a   : > { %2585 = vmatpush3.msra.mxu1 %v3474_v53  ;;  %2622 = vmatpush3.msra.mxu0 %v3479_v54 }
 0x15b   : > { %2586 = vmatprep.subr.mxu1 %v2885_v2  ;;  %2623 = vmatprep.subr.mxu0 %v2885_v2 }
 0x15c   : > { %2587 = vmatpush3.msra.mxu1 %v3479_v54  ;;  %2624 = vmatpush3.msra.mxu0 %v3484_v55  ;;  %v3731_v35 = vpop.f32.mrf.mxu0 }
 0x15d   : > { %2588 = vmatprep.subr.mxu1 %v2885_v2  ;;  %2625 = vmatprep.subr.mxu0 %v2885_v2 }
 0x15e   : > { %2589 = vmatpush3.msra.mxu1 %v3484_v55  ;;  %2626 = vmatpush3.msra.mxu0 %v3489_v56  ;;  %v2484_v36 = vpop.f32.mrf.mxu0 }
 0x15f   : > { %2590 = vmatprep.subr.mxu1 %v2885_v2  ;;  %2627 = vmatprep.mubr.msk.f32.mxu0 %vm2886_vm0, %v2885_v2 }
 0x160   : > { %2591 = vmatpush3.msra.mxu1 %v3489_v56  ;;  %2665 = vmatprep.subr.mxu0 %v2885_v2 }
 0x161   : > { %2593 = vmatmul.mubr.f32.vlgmr.msra.gmra.mxu1 %v1148_v34  ;;  %2630 = vmatprep.subr.mxu1 %v2885_v2 }
 0x162   : > { %2631 = vmatpush3.msra.mxu1 %v3412_v41  ;;  %2662 = vmatprep.mubr.msk.f32.mxu1 %vm2886_vm0, %v2885_v2 }
 0x163   : > { %2632 = vmatprep.subr.mxu1 %v2885_v2 }
 0x164   : > { %2633 = vmatpush3.msra.mxu1 %v3419_v42 }
 0x165   : > { %2634 = vmatprep.subr.mxu1 %v2885_v2 }
 0x166   : > { %2635 = vmatpush3.msra.mxu1 %v3424_v43 }
 0x167   : > { %2636 = vmatprep.subr.mxu1 %v2885_v2 }
 0x168   : > { %2637 = vmatpush3.msra.mxu1 %v3429_v44 }
 0x169   : > { %2638 = vmatprep.subr.mxu1 %v2885_v2 }
 0x16a   : > { %2639 = vmatpush3.msra.mxu1 %v3434_v45 }
 0x16b   : > { %2640 = vmatprep.subr.mxu1 %v2885_v2 }
 0x16c   : > { %2641 = vmatpush3.msra.mxu1 %v3439_v46 }
 0x16d   : > { %2642 = vmatprep.subr.mxu1 %v2885_v2 }
 0x16e   : > { %2643 = vmatpush3.msra.mxu1 %v3444_v47 }
 0x16f   : > { %2644 = vmatprep.subr.mxu1 %v2885_v2 }
 0x170   : > { %2645 = vmatpush3.msra.mxu1 %v3449_v48 }
 0x171   : > { %2646 = vmatprep.subr.mxu1 %v2885_v2 }
 0x172   : > { %2647 = vmatpush3.msra.mxu1 %v3454_v49 }
 0x173   : > { %2648 = vmatprep.subr.mxu1 %v2885_v2 }
 0x174   : > { %2649 = vmatpush3.msra.mxu1 %v3459_v50 }
 0x175   : > { %2650 = vmatprep.subr.mxu1 %v2885_v2 }
 0x176   : > { %2651 = vmatpush3.msra.mxu1 %v3464_v51 }
 0x177   : > { %2652 = vmatprep.subr.mxu1 %v2885_v2 }
 0x178   : > { %2653 = vmatpush3.msra.mxu1 %v3469_v52 }
 0x179   : > { %2654 = vmatprep.subr.mxu1 %v2885_v2 }
 0x17a   : > { %2655 = vmatpush3.msra.mxu1 %v3474_v53 }
 0x17b   : > { %2656 = vmatprep.subr.mxu1 %v2885_v2  ;;  %v921_v61 = vpop.permute.xlu1 %920 }
 0x17c   : > { %2657 = vmatpush3.msra.mxu1 %v3479_v54 }
 0x17d   : > { %2658 = vmatprep.subr.mxu1 %v2885_v2 }
 0x17e   : > { %2659 = vmatpush3.msra.mxu1 %v3484_v55 }
 0x17f   : > { %2660 = vmatprep.subr.mxu1 %v2885_v2 }
 0x180   : > { %2661 = vmatpush3.msra.mxu1 %v3489_v56 }
 0x1bd   : > { %v989_v62 = vpop.f32.mrf.mxu1 }
 0x1be   : > { %v990_v0 = vadd.f32 %v989_v62, %v921_v61 }
 0x1bf   : > { %v2449_v1 = vpop.f32.mrf.mxu1 }
 0x1c0   : > { %v997_v3 = vadd.f32 %v996_v63, %v990_v0 }
 0x1c2   : > { %999 = vst.msk [vmem:[%s3754_s17] sm:$0xff] %vm998_vm1, %v997_v3 }
 0x1dd   : > { %v1217_v4 = vpop.f32.mrf.mxu1 }
 0x1de   : > { %2628 = vmatmul.mubr.f32.vlgmr.msra.gmra.mxu0 %v1217_v4 }
 0x1df   : > { %2666 = vmatpush3.msra.mxu0 %v3412_v41  ;;  %v1219_v5 = vpop.f32.mrf.mxu1  ;;  %2697 = vmatprep.mubr.msk.f32.mxu0 %vm2886_vm0, %v2885_v2  ;;  %v2889_v41 = vmov 4  }
 0x1e0   : > { %2667 = vmatprep.subr.mxu0 %v2885_v2  ;;  %2663 = vmatmul.mubr.f32.vlgmr.msra.gmra.mxu1 %v1219_v5 }
 0x1e1   : > { %2668 = vmatpush3.msra.mxu0 %v3419_v42  ;;  %v1359_v6 = vpop.f32.mrf.mxu1  ;;  %v2891_v42 = vmov 3  }
 0x1e2   : > { %2669 = vmatprep.subr.mxu0 %v2885_v2  ;;  %1523 = vperm.xlu0 %2773, %v1359_v6  }
 0x1e3   : > { %2670 = vmatpush3.msra.mxu0 %v3424_v43  ;;  %1442 = vperm.xlu1 %2772, %v1359_v6   ;;  %v2489_v7 = vpop.f32.mrf.mxu1 }
 0x1e4   : > { %2671 = vmatprep.subr.mxu0 %v2885_v2 }
 0x1e5   : > { %2672 = vmatpush3.msra.mxu0 %v3429_v44 }
 0x1e6   : > { %2673 = vmatprep.subr.mxu0 %v2885_v2  ;;  %2776 = vset.pattern.permute.xlu0 %v2889_v41 }
 0x1e7   : > { %2674 = vmatpush3.msra.mxu0 %v3434_v45  ;;  %2774 = vset.pattern.permute.xlu1 %v2890_v8 }
 0x1e8   : > { %2675 = vmatprep.subr.mxu0 %v2885_v2  ;;  %1604 = vperm.xlu1 %2774, %v1359_v6  }
 0x1e9   : > { %2676 = vmatpush3.msra.mxu0 %v3439_v46  ;;  %1766 = vperm.xlu0 %2776, %v1359_v6  }
 0x1ea   : > { %2677 = vmatprep.subr.mxu0 %v2885_v2 }
 0x1eb   : > { %2678 = vmatpush3.msra.mxu0 %v3444_v47 }
 0x1ec   : > { %2679 = vmatprep.subr.mxu0 %v2885_v2  ;;  %2775 = vset.pattern.permute.xlu1 %v2891_v42 }
 0x1ed   : > { %2680 = vmatpush3.msra.mxu0 %v3449_v48  ;;  %1685 = vperm.xlu1 %2775, %v1359_v6  }
 0x1ee   : > { %2681 = vmatprep.subr.mxu0 %v2885_v2 }
 0x1ef   : > { %2682 = vmatpush3.msra.mxu0 %v3454_v49 }
 0x1f0   : > { %2683 = vmatprep.subr.mxu0 %v2885_v2 }
 0x1f1   : > { %2684 = vmatpush3.msra.mxu0 %v3459_v50 }
 0x1f2   : > { %2685 = vmatprep.subr.mxu0 %v2885_v2 }
 0x1f3   : > { %2686 = vmatpush3.msra.mxu0 %v3464_v51 }
 0x1f4   : > { %2687 = vmatprep.subr.mxu0 %v2885_v2 }
 0x1f5   : > { %2688 = vmatpush3.msra.mxu0 %v3469_v52 }
 0x1f6   : > { %2689 = vmatprep.subr.mxu0 %v2885_v2 }
 0x1f7   : > { %2690 = vmatpush3.msra.mxu0 %v3474_v53 }
 0x1f8   : > { %2691 = vmatprep.subr.mxu0 %v2885_v2 }
 0x1f9   : > { %2692 = vmatpush3.msra.mxu0 %v3479_v54 }
 0x1fa   : > { %2693 = vmatprep.subr.mxu0 %v2885_v2 }
 0x1fb   : > { %2694 = vmatpush3.msra.mxu0 %v3484_v55 }
 0x1fc   : > { %2695 = vmatprep.subr.mxu0 %v2885_v2 }
 0x1fd   : > { %2696 = vmatpush3.msra.mxu0 %v3489_v56  ;;  %v1511_v43 = vpop.f32.mrf.mxu0 }
 0x1fe   : > { %2698 = vmatmul.mubr.f32.vlgmr.msra.gmra.mxu0 %v3731_v35 }
 0x1ff   : > { %v2559_v44 = vpop.f32.mrf.mxu0 }
 0x201   : > { %v1436_v45 = vpop.f32.mrf.mxu1 }
 0x203   : > { %v2524_v46 = vpop.f32.mrf.mxu1 }
 0x221   : > { %v1592_v47 = vpop.f32.mrf.mxu1 }
 0x223   : > { %v2594_v48 = vpop.f32.mrf.mxu1 }
 0x224   : > { %2790 = shalt.err (!%p2787_p5)
}
 0x225   : > { %s2791_s22 = scalar_lea.hbm %s1864_s7, 128  ;;  %s2795_s18 = scalar_lea.hbm %s3886_s12, 256 }
 0x226   : > { %p2792_p6 = scmp.ne.s32.totalorder %s1864_s7, %s2791_s22  ;;  %p2796_p10 = scmp.lt.s32.totalorder %s1864_s7, %s3886_s12 }
 0x227   : > { %p2797_p11 = scmp.lt.s32.totalorder %s2795_s18, %s2791_s22 }
 0x228   : > { %p2793_p7 = pnand %p2792_p6, %p3009_p4 }
 0x229   : > { %p2798_p12 = por %p2797_p11, %p2796_p10 }
 0x22a   : > { %p2794_p9 = pneg %p2793_p7 }
 0x22c   : > { %p2799_p13 = pnand %p2798_p12, %p2794_p9 }
 0x22e   : > { %2802 = shalt.err (!%p2799_p13)
}
 0x22f   : > { %2702 = dma.vmem_to_hbm [thread:$0]  (%p3009_p4), %s1867_s14, 128, %s1864_s7, %s1847_s24   ;;  %v1368_v2 = vpop.permute.xlu0 %1367  ;;  %v1598_v50 = vsub.s32 1, %v3742_v40  ;;  %v1679_v12 = vsub.s32 2, %v3742_v40  ;;  %v1760_v13 = vsub.s32 3, %v3742_v40  ;;  %v1841_v26 = vsub.s32 4, %v3742_v40 }
 0x230   : > { %v1437_v49 = vadd.f32 %v1436_v45, %v1368_v2  ;;  %s2700_s26 = smul.u32 40, %s3749_s29  ;;  %s2893_s22 = smov [#allocation5]  }
 0x231   : > { %s2701_s14 = smul.u32 640, %s2875_s30  ;;  %s1852_s30 = scalar_lea.sflag [#allocation6], %s3749_s29 }
 0x232   : > { %v1599_v51 = vrot.slane %v1437_v49, %v1598_v50  ;;  %v1518_v53 = vrot.slane %v1437_v49, %v3745_v57  ;;  %s583_s1 = scalar_lea.vmem [#allocation5], %s2700_s26  ;;  %v1680_v17 = vrot.slane %v1437_v49, %v1679_v12  ;;  %v1761_v23 = vrot.slane %v1437_v49, %v1760_v13  ;;  %s2807_s17 = sshll.u32 %s2893_s22, 4  ;;  %s2808_s17 = int_to_ptr.vmem [resolvable:$false] %s2807_s17 }
 0x233   : > { %s1882_s7 = sshll.u32 %s583_s1, 4  ;;  %v1842_v30 = vrot.slane %v1437_v49, %v1841_v26  ;;  %s3824_s0 = scalar_lea.hbm %s3887_s13, %s2701_s14  ;;  %s3826_s7 = int_to_ptr.vmem [resolvable:$true] %s1882_s7 }
 0x234   : > { %s2803_s25 = scalar_lea.vmem %s3826_s7, 640  ;;  %s2809_s16 = scalar_lea.vmem %s2808_s17, 1280 }
 0x235   : > { %p2804_p0 = scmp.ne.s32.totalorder %s3826_s7, %s2803_s25  ;;  %p2810_p3 = scmp.lt.s32.totalorder %s3826_s7, %s2808_s17 }
 0x236   : > { %p2811_p5 = scmp.lt.s32.totalorder %s2809_s16, %s2803_s25 }
 0x237   : > { %p2805_p1 = pnand %p2804_p0, %p3009_p4 }
 0x238   : > { %p2812_p6 = por %p2811_p5, %p2810_p3 }
 0x239   : > { %p2806_p2 = pneg %p2805_p1 }
 0x23b   : > { %p2813_p7 = pnand %p2812_p6, %p2806_p2 }
 0x25d   : > { %v1524_v52 = vpop.permute.xlu0 %1523 }
 0x25e   : > { %v1593_v54 = vadd.f32 %v1592_v47, %v1524_v52  ;;  %v1443_v55 = vpop.permute.xlu1 %1442 }
 0x25f   : > { %v1512_v56 = vadd.f32 %v1511_v43, %v1443_v55 }
 0x260   : > { %v1600_v9 = vadd.f32 %v1599_v51, %v1593_v54 }
 0x261   : > { %v1519_v10 = vadd.f32 %v1518_v53, %v1512_v56 }
 0x262   : > { %2110 = vst.msk [vmem:[%s583_s1 + $0x8] sm:$0xff] %vm998_vm1, %v1600_v9 }
 0x263   : > { %1521 = vst.msk [vmem:[%s583_s1] sm:$0xff] %vm998_vm1, %v1519_v10  ;;  %v1605_v11 = vpop.permute.xlu1 %1604 }
 0x264   : > { %v1767_v27 = vpop.permute.xlu0 %1766 }
 0x268   : > { %v1686_v15 = vpop.permute.xlu1 %1685 }
 0x29e   : > { %v1673_v14 = vpop.f32.mrf.mxu0 }
 0x29f   : > { %v1674_v16 = vadd.f32 %v1673_v14, %v1605_v11 }
 0x2a0   : > { %v2629_v18 = vpop.f32.mrf.mxu0  ;;  %v1754_v19 = vpop.f32.mrf.mxu1 }
 0x2a1   : > { %v1681_v20 = vadd.f32 %v1680_v17, %v1674_v16  ;;  %v1755_v22 = vadd.f32 %v1754_v19, %v1686_v15 }
 0x2a2   : > { %v2664_v24 = vpop.f32.mrf.mxu1 }
 0x2a3   : > { %2111 = vst.msk [vmem:[%s583_s1 + $0x10] sm:$0xff] %vm998_vm1, %v1681_v20  ;;  %v1762_v25 = vadd.f32 %v1761_v23, %v1755_v22 }
 0x2a5   : > { %2112 = vst.msk [vmem:[%s583_s1 + $0x18] sm:$0xff] %vm998_vm1, %v1762_v25 }
 0x2be   : > { %v1835_v28 = vpop.f32.mrf.mxu0 }
 0x2bf   : > { %v1836_v29 = vadd.f32 %v1835_v28, %v1767_v27 }
 0x2c0   : > { %v2699_v31 = vpop.f32.mrf.mxu0 }
 0x2c1   : > { %v1843_v32 = vadd.f32 %v1842_v30, %v1836_v29 }
 0x2c3   : > { %2113 = vst.msk [vmem:[%s583_s1 + $0x20] sm:$0xff] %vm998_vm1, %v1843_v32 }
 0x2c4   : > { %2816 = shalt.err (!%p2813_p7)
}
 0x2c5   : > { %s2817_s18 = scalar_lea.hbm %s3824_s0, 640  ;;  %s2821_s1 = scalar_lea.hbm %s3887_s13, 1280 }
 0x2c6   : > { %p2818_p9 = scmp.ne.s32.totalorder %s3824_s0, %s2817_s18  ;;  %p2822_p12 = scmp.lt.s32.totalorder %s3824_s0, %s3887_s13 }
 0x2c7   : > { %p2823_p13 = scmp.lt.s32.totalorder %s2821_s1, %s2817_s18 }
 0x2c8   : > { %p2819_p10 = pnand %p2818_p9, %p3009_p4 }
 0x2c9   : > { %p2824_p0 = por %p2823_p13, %p2822_p12 }
 0x2ca   : > { %p2820_p11 = pneg %p2819_p10 }
 0x2cc   : > { %p2825_p1 = pnand %p2824_p0, %p2820_p11 }
 0x2ce   : > { %2828 = shalt.err (!%p2825_p1)
}
 0x2cf   : > { %s2894_s23 = smov 128   ;;  %s2895_s25 = smov 8  }
 0x2d0   : > { %2703 = dma.vmem_to_hbm [thread:$0]  (%p3009_p4), %s3826_s7, 640, %s3824_s0, %s1852_s30, %s2894_s23, %s2894_s23, %s2895_s25  }
 0x2d1 PF: > { %p2713_p2 = scmp.ge.s32.totalorder %s2883_s15, 2  ;;  %s1897_s22 = sand.u32 1, %s2863_s27  }
 0x2d2   : > { %s1898_s17 = scalar_lea.sflag [#allocation4], %s1897_s22 }
 0x2d3   : > { %p2707_p3 = pnand %p2713_p2, %p3016_p8 }
 0x2d5   : > { %p2708_p5 = pneg %p2707_p3 }
 0x2d7   : > { %2854 = dma.done.wait (%p2708_p5), %s1898_s17, 128  }
 0x2d8   : > { %2856 = vsyncadd (%p2708_p5), %s1898_s17, 4294967168  ;;  %s1907_s16 = scalar_lea.sflag [#allocation6], %s1897_s22 }
 0x2d9   : > { %2858 = dma.done.wait (%p2708_p5), %s1907_s16, 640  }
 0x2da   : > { %2860 = vsyncadd (%p2708_p5), %s1907_s16, 4294966656  ;;  %s32_s15 = sadd.s32 1, %s2883_s15   ;;  %s3903_s19 = sld [smem:[#allocation9_spill]] }
 0x2db   : > { %p29_p6 = scmp.ge.s32.totalorder %s32_s15, 4   ;;  %s3904_s29 = sld [smem:[#allocation12_spill]] }
 0x2dc   : > { %s3905_s30 = sld [smem:[#allocation10_spill]]  ;;  %s3907_s27 = smov %s2867_s28 }
 0x2dd   : > { %s3906_s14 = sld [smem:[#allocation11_spill]]  ;;  %31 = sbr.rel (!%p29_p6) target bundleno = 9 (0x9), region = 149 }
 0x2e0   : > { %s3908_s28 = smov %s3903_s19 }
 0x2e2   :  { %1912 = vsyncpa [#allocation4], 1 }
 0x2e3   :  { %1914 = vsyncpa [#allocation4 + $0x1], 1 }
 0x2e4   :  { %1915 = vsyncpa [#allocation6], 1 }
 0x2e5   :  { %1917 = vsyncpa [#allocation6 + $0x1], 1 }

</bundles_post_ra>
